<compile_context>
chip_gen: v7x
topology: tpu7x:2x2x1
jax: 0.10.0
libtpu: 0.0.40
codegen_flags: <defaults>
</compile_context>

<pallas_src>
import functools

import jax
import jax.numpy as jnp
from jax.experimental import pallas as pl
from jax.experimental.pallas import tpu as pltpu

EPS = 1e-5


def _bn_wide(u, p, gamma, beta, *, inv_m, relu):
    """Training-mode BN on a (rows, W*C) block where channel = lane % C.

    Per-channel stats require a sum over rows AND over the W lane groups; the
    group reduce + broadcast is a single tiny f32 matmul with the 0/1 matrix
    p[l, l'] = (l % C == l' % C).  All stats / normalization stay f32.
    """
    cs = jnp.sum(u, axis=0, keepdims=True)              # (1, L)
    css = jnp.sum(u * u, axis=0, keepdims=True)         # (1, L)
    mu = jnp.dot(cs, p, preferred_element_type=jnp.float32) * inv_m
    ex2 = jnp.dot(css, p, preferred_element_type=jnp.float32) * inv_m
    var = jnp.maximum(ex2 - mu * mu, 0.0)                # clamp: single-pass var can dip < 0
    scale = gamma * jax.lax.rsqrt(var + EPS)
    shift = beta - mu * scale
    y = u * scale + shift                                # fused normalize + affine
    return jnp.maximum(y, 0.0) if relu else y


def bottleneck_kernel(x_ref, w1_ref, w2_ref, s_ref, w3_ref, pmid_ref, pout_ref,
                      g1_ref, be1_ref, g2_ref, be2_ref, g3_ref, be3_ref,
                      o_ref, *, inv_m, matmul_dtype):
    f32 = jnp.float32
    x = x_ref[...]                                       # (NH, W*Cin) f32; also the residual
    xm = x.astype(matmul_dtype)
    p_mid = pmid_ref[...]
    p_out = pout_ref[...]

    # ---- conv1 (1x1) + BN1 + ReLU (conv bias cancelled by BN mean) ----------
    u1 = jnp.dot(xm, w1_ref[...].astype(matmul_dtype), preferred_element_type=f32)
    y1 = _bn_wide(u1, p_mid, g1_ref[...], be1_ref[...], inv_m=inv_m, relu=True)

    # ---- conv2 (3x3, pad=1, stride=1) as banded block matmuls ---------------
    # dy handled by 0/1 image-local row-shift matrices (S_up/S_dn); dx and the
    # w-boundary zero padding are folded into the banded block weights B_dy.
    # -> 5 dense MXU matmuls, no masks, no unaligned slices, no scratch.
    y1m = y1.astype(matmul_dtype)
    u2 = jnp.dot(y1m, w2_ref[1].astype(matmul_dtype),          # dy = 0
                 preferred_element_type=f32)
    for s_idx, w2_idx in ((0, 0), (1, 2)):                      # dy = -1, dy = +1
        shifted = jnp.dot(s_ref[s_idx].astype(matmul_dtype), y1m,
                          preferred_element_type=f32)
        u2 = u2 + jnp.dot(shifted.astype(matmul_dtype),
                          w2_ref[w2_idx].astype(matmul_dtype),
                          preferred_element_type=f32)
    y2 = _bn_wide(u2, p_mid, g2_ref[...], be2_ref[...], inv_m=inv_m, relu=True)

    # ---- conv3 (1x1) + BN3 + residual + ReLU; lane-dense (W*Cout) store -----
    u3 = jnp.dot(y2.astype(matmul_dtype), w3_ref[...].astype(matmul_dtype),
                 preferred_element_type=f32)
    z = _bn_wide(u3, p_out, g3_ref[...], be3_ref[...], inv_m=inv_m, relu=False)
    o_ref[...] = jnp.maximum(z + x, 0.0)


def _full_block(shape):
    nd = len(shape)
    return pl.BlockSpec(shape, lambda i, _nd=nd: (0,) * _nd)


def _group_bcast_matrix(length, channels):
    lane = jnp.arange(length)
    return (lane[:, None] % channels == lane[None, :] % channels).astype(jnp.float32)


@functools.partial(jax.jit, static_argnames=("matmul_dtype",))
def bottleneck_forward(x_nchw, params, matmul_dtype=jnp.bfloat16):
    (w1, b1, g1, be1, w2col, b2, g2, be2, w3, b3, g3, be3) = params
    # Conv biases feeding straight into training-mode BN are cancelled exactly
    # by the mean subtraction; they never reach the kernel.
    del b1, b2, b3

    N, Cin, H, W = x_nchw.shape
    Cmid = w1.shape[1]
    Cout = w3.shape[1]
    assert Cin == Cout, "identity path requires Cin == Cout (no i_downsample)"
    NH = N * H
    L_in, L_mid, L_out = W * Cin, W * Cmid, W * Cout
    M = N * H * W

    # Layout glue (plain JAX): NCHW -> NHWC -> rows=(n,h), lanes=(w,c).
    # TODO(synk): at production sizes keep NHWC end-to-end to avoid this HBM
    #   transpose round trip (review item).
    x_wide = jnp.transpose(x_nchw, (0, 2, 3, 1)).reshape(NH, L_in)

    # Block-diagonal 1x1-conv weights: lane group w applies the same (Cin,Cmid).
    eye_w = jnp.eye(W, dtype=jnp.float32)
    w1bd = jnp.kron(eye_w, w1)                              # (W*Cin,  W*Cmid)
    w3bd = jnp.kron(eye_w, w3)                              # (W*Cmid, W*Cout)

    # conv2 weights: fold the dx taps + w-boundary padding into banded block
    # matrices, one per dy.  w2col rows are ordered (ky, kx, ci).
    w2taps = w2col.reshape(3, 3, Cmid, Cmid)                # (ky, kx, ci, co)
    w2rows = jnp.stack([
        sum(jnp.kron(jnp.eye(W, k=-dx, dtype=jnp.float32), w2taps[ky, dx + 1])
            for dx in (-1, 0, 1))
        for ky in range(3)])                                # (3, W*Cmid, W*Cmid)

    # Image-local row (dy) shift matrices; cross-image and h-boundary rows are
    # zero by construction (no masks needed in the kernel).
    shifts = jnp.stack([
        jnp.kron(jnp.eye(N, dtype=jnp.float32),
                 jnp.eye(H, k=dy, dtype=jnp.float32))
        for dy in (-1, 1)])                                 # (2, NH, NH)

    # BN group reduce/broadcast matrices and lane-tiled affine params.
    p_mid = _group_bcast_matrix(L_mid, Cmid)                # (W*Cmid, W*Cmid)
    p_out = _group_bcast_matrix(L_out, Cout)                # (W*Cout, W*Cout)
    tile = lambda v: jnp.tile(v.reshape(1, -1), (1, W))
    g1w, be1w = tile(g1), tile(be1)
    g2w, be2w = tile(g2), tile(be2)
    g3w, be3w = tile(g3), tile(be3)

    inputs = [x_wide, w1bd, w2rows, shifts, w3bd, p_mid, p_out,
              g1w, be1w, g2w, be2w, g3w, be3w]

    kernel = functools.partial(bottleneck_kernel, inv_m=1.0 / M,
                               matmul_dtype=matmul_dtype)

    flops = (2 * NH * (L_in * L_mid + L_mid * L_out)            # conv1 + conv3
             + 3 * 2 * NH * L_mid * L_mid                        # conv2 banded matmuls
             + 2 * 2 * NH * NH * L_mid                           # conv2 row shifts
             + 2 * (2 * 2 * L_mid * L_mid) + 2 * 2 * L_out * L_out)  # BN broadcasts
    bytes_accessed = (sum(int(a.size * a.dtype.itemsize) for a in inputs)
                      + NH * L_out * 4)

    out = pl.pallas_call(
        kernel,
        out_shape=jax.ShapeDtypeStruct((NH, L_out), jnp.float32),
        grid=(1,),
        in_specs=[_full_block(a.shape) for a in inputs],
        out_specs=_full_block((NH, L_out)),
        compiler_params=pltpu.CompilerParams(
            dimension_semantics=("arbitrary",),
            vmem_limit_bytes=32 * 1024 * 1024),
        cost_estimate=pl.CostEstimate(
            flops=flops,
            transcendentals=2 * L_mid + L_out,
            bytes_accessed=bytes_accessed),
    )(*inputs)

    # (NH, W*Cout) has the same row-major bytes as NHWC; transpose back to NCHW.
    return jnp.transpose(out.reshape(N, H, W, Cout), (0, 3, 1, 2))


# -----------------------------------------------------------------------------
# Pure-JAX reference (NCHW, lax.conv, WITH conv biases) for correctness checks
# -----------------------------------------------------------------------------
def reference_forward(x, params):
    (w1, b1, g1, be1, w2col, b2, g2, be2, w3, b3, g3, be3) = params
    Cmid = w1.shape[1]
    Cout = w3.shape[1]

    def bn_nchw(y, gamma, beta):
        mu = jnp.mean(y, axis=(0, 2, 3), keepdims=True)
        var = jnp.mean((y - mu) ** 2, axis=(0, 2, 3), keepdims=True)
        g = gamma.reshape(1, -1, 1, 1)
        b = beta.reshape(1, -1, 1, 1)
        return (y - mu) * jax.lax.rsqrt(var + EPS) * g + b

    def conv(x, w_oihw, pad):
        return jax.lax.conv_general_dilated(
            x, w_oihw, window_strides=(1, 1), padding=pad,
            dimension_numbers=("NCHW", "OIHW", "NCHW"))

    identity = x
    w1_oihw = w1.T.reshape(Cmid, -1, 1, 1)
    y = conv(x, w1_oihw, "VALID") + b1.reshape(1, -1, 1, 1)
    y = jax.nn.relu(bn_nchw(y, g1, be1))

    w2_oihw = w2col.reshape(3, 3, Cmid, Cmid).transpose(3, 2, 0, 1)
    y = conv(y, w2_oihw, ((1, 1), (1, 1))) + b2.reshape(1, -1, 1, 1)
    y = jax.nn.relu(bn_nchw(y, g2, be2))

    w3_oihw = w3.T.reshape(Cout, Cmid, 1, 1)
    y = conv(y, w3_oihw, "VALID") + b3.reshape(1, -1, 1, 1)
    y = bn_nchw(y, g3, be3)
    return jax.nn.relu(y + identity)


if __name__ == "__main__":
    key = jax.random.PRNGKey(0)
    N, H, W = 2, 16, 16
    Cmid = 4                      # out_channels
    Cout = Cmid * 4               # out_channels * expansion
    Cin = Cout                    # i_downsample is None -> residual shapes match

    ks = jax.random.split(key, 13)
    x = jax.random.normal(ks[0], (N, Cin, H, W), jnp.float32)

    # conv1: 1x1, Cin -> Cmid (stored as (Cin, Cmid) matmul weight)
    w1 = 0.2 * jax.random.normal(ks[1], (Cin, Cmid), jnp.float32)
    b1 = 0.1 * jax.random.normal(ks[2], (1, Cmid), jnp.float32)
    g1 = 1.0 + 0.1 * jax.random.normal(ks[3], (1, Cmid), jnp.float32)
    be1 = 0.1 * jax.random.normal(ks[4], (1, Cmid), jnp.float32)

    # conv2: 3x3, Cmid -> Cmid (im2col-style rows ordered (ky, kx, c))
    w2col = 0.2 * jax.random.normal(ks[5], (9 * Cmid, Cmid), jnp.float32)
    b2 = 0.1 * jax.random.normal(ks[6], (1, Cmid), jnp.float32)
    g2 = 1.0 + 0.1 * jax.random.normal(ks[7], (1, Cmid), jnp.float32)
    be2 = 0.1 * jax.random.normal(ks[8], (1, Cmid), jnp.float32)

    # conv3: 1x1, Cmid -> Cout
    w3 = 0.2 * jax.random.normal(ks[9], (Cmid, Cout), jnp.float32)
    b3 = 0.1 * jax.random.normal(ks[10], (1, Cout), jnp.float32)
    g3 = 1.0 + 0.1 * jax.random.normal(ks[11], (1, Cout), jnp.float32)
    be3 = 0.1 * jax.random.normal(ks[12], (1, Cout), jnp.float32)

    params = (w1, b1, g1, be1, w2col, b2, g2, be2, w3, b3, g3, be3)

    ref = reference_forward(x, params)

    # bf16 MXU-operand path (production setting): loose tolerance, since bf16
    # operand rounding is amplified by the BN normalization.
    out_bf16 = jax.block_until_ready(bottleneck_forward(x, params))
    assert out_bf16.shape == (N, Cout, H, W), out_bf16.shape
    err_bf16 = float(jnp.max(jnp.abs(out_bf16 - ref)))
    assert err_bf16 < 2e-1, err_bf16

    # f32-operand path: strict check of the kernel structure / BN semantics.
    out_f32 = jax.block_until_ready(
        bottleneck_forward(x, params, matmul_dtype=jnp.float32))
    err_f32 = float(jnp.max(jnp.abs(out_f32 - ref)))
    assert err_f32 < 5e-4, err_f32

    print("KERNEL_OK")
</pallas_src>

<mosaic_0001>
module attributes {stable_mosaic.version = 11 : i64} {
  func.func @bottleneck_kernel(%arg0: i32, %arg1: memref<32x256xf32, #tpu.memory_space<vmem>>, %arg2: memref<256x64xf32, #tpu.memory_space<vmem>>, %arg3: memref<3x64x64xf32, #tpu.memory_space<vmem>>, %arg4: memref<2x32x32xf32, #tpu.memory_space<vmem>>, %arg5: memref<64x256xf32, #tpu.memory_space<vmem>>, %arg6: memref<64x64xf32, #tpu.memory_space<vmem>>, %arg7: memref<256x256xf32, #tpu.memory_space<vmem>>, %arg8: memref<1x64xf32, #tpu.memory_space<vmem>>, %arg9: memref<1x64xf32, #tpu.memory_space<vmem>>, %arg10: memref<1x64xf32, #tpu.memory_space<vmem>>, %arg11: memref<1x64xf32, #tpu.memory_space<vmem>>, %arg12: memref<1x256xf32, #tpu.memory_space<vmem>>, %arg13: memref<1x256xf32, #tpu.memory_space<vmem>>, %arg14: memref<32x256xf32, #tpu.memory_space<vmem>>) attributes {dimension_semantics = [#tpu.dimension_semantics<arbitrary>], iteration_bounds = array<i64: 1>, scalar_prefetch = 0 : i64, scratch_operands = 0 : i64, tpu.core_type = #tpu.core_type<tc>, window_params = [{pipeline_mode = #tpu.pipeline_mode<synchronous>, transform_indices = @transform_0, window_bounds = array<i64: 32, 256>}, {pipeline_mode = #tpu.pipeline_mode<synchronous>, transform_indices = @transform_1, window_bounds = array<i64: 256, 64>}, {pipeline_mode = #tpu.pipeline_mode<synchronous>, transform_indices = @transform_2, window_bounds = array<i64: 3, 64, 64>}, {pipeline_mode = #tpu.pipeline_mode<synchronous>, transform_indices = @transform_3, window_bounds = array<i64: 2, 32, 32>}, {pipeline_mode = #tpu.pipeline_mode<synchronous>, transform_indices = @transform_4, window_bounds = array<i64: 64, 256>}, {pipeline_mode = #tpu.pipeline_mode<synchronous>, transform_indices = @transform_5, window_bounds = array<i64: 64, 64>}, {pipeline_mode = #tpu.pipeline_mode<synchronous>, transform_indices = @transform_6, window_bounds = array<i64: 256, 256>}, {pipeline_mode = #tpu.pipeline_mode<synchronous>, transform_indices = @transform_7, window_bounds = array<i64: 1, 64>}, {pipeline_mode = #tpu.pipeline_mode<synchronous>, transform_indices = @transform_8, window_bounds = array<i64: 1, 64>}, {pipeline_mode = #tpu.pipeline_mode<synchronous>, transform_indices = @transform_9, window_bounds = array<i64: 1, 64>}, {pipeline_mode = #tpu.pipeline_mode<synchronous>, transform_indices = @transform_10, window_bounds = array<i64: 1, 64>}, {pipeline_mode = #tpu.pipeline_mode<synchronous>, transform_indices = @transform_11, window_bounds = array<i64: 1, 256>}, {pipeline_mode = #tpu.pipeline_mode<synchronous>, transform_indices = @transform_12, window_bounds = array<i64: 1, 256>}, {pipeline_mode = #tpu.pipeline_mode<synchronous>, transform_indices = @transform_13, window_bounds = array<i64: 32, 256>}]} {
    %c0 = arith.constant 0 : index
    %c0_0 = arith.constant 0 : index
    %0 = vector.load %arg1[%c0, %c0_0] : memref<32x256xf32, #tpu.memory_space<vmem>>, vector<32x256xf32>
    %1 = arith.truncf %0 : vector<32x256xf32> to vector<32x256xbf16>
    %c0_1 = arith.constant 0 : index
    %c0_2 = arith.constant 0 : index
    %2 = vector.load %arg6[%c0_1, %c0_2] : memref<64x64xf32, #tpu.memory_space<vmem>>, vector<64x64xf32>
    %c0_3 = arith.constant 0 : index
    %c0_4 = arith.constant 0 : index
    %3 = vector.load %arg7[%c0_3, %c0_4] : memref<256x256xf32, #tpu.memory_space<vmem>>, vector<256x256xf32>
    %c0_5 = arith.constant 0 : index
    %c0_6 = arith.constant 0 : index
    %4 = vector.load %arg2[%c0_5, %c0_6] : memref<256x64xf32, #tpu.memory_space<vmem>>, vector<256x64xf32>
    %5 = arith.truncf %4 : vector<256x64xf32> to vector<256x64xbf16>
    %cst = arith.constant dense<0.000000e+00> : vector<32x64xf32>
    %6 = tpu.matmul %1, %5, %cst {dimension_numbers = #tpu.dot_dimension_numbers<[1], [0], [0], [1], [0, 0, 1, 1], [], []>} : vector<32x256xbf16>, vector<256x64xbf16>, vector<32x64xf32> -> vector<32x64xf32>
    %c0_7 = arith.constant 0 : index
    %c0_8 = arith.constant 0 : index
    %7 = vector.load %arg8[%c0_7, %c0_8] : memref<1x64xf32, #tpu.memory_space<vmem>>, vector<1x64xf32>
    %c0_9 = arith.constant 0 : index
    %c0_10 = arith.constant 0 : index
    %8 = vector.load %arg9[%c0_9, %c0_10] : memref<1x64xf32, #tpu.memory_space<vmem>>, vector<1x64xf32>
    %cst_11 = arith.constant dense<0.000000e+00> : vector<64xf32>
    %9 = vector.multi_reduction <add>, %6, %cst_11 [0] : vector<32x64xf32> to vector<64xf32>
    %10 = vector.shape_cast %9 : vector<64xf32> to vector<1x64xf32>
    %11 = arith.mulf %6, %6 : vector<32x64xf32>
    %cst_12 = arith.constant dense<0.000000e+00> : vector<64xf32>
    %12 = vector.multi_reduction <add>, %11, %cst_12 [0] : vector<32x64xf32> to vector<64xf32>
    %13 = vector.shape_cast %12 : vector<64xf32> to vector<1x64xf32>
    %cst_13 = arith.constant dense<0.000000e+00> : vector<1x64xf32>
    %14 = tpu.matmul %10, %2, %cst_13 {dimension_numbers = #tpu.dot_dimension_numbers<[1], [0], [0], [1], [0, 0, 1, 1], [], []>} : vector<1x64xf32>, vector<64x64xf32>, vector<1x64xf32> -> vector<1x64xf32>
    %cst_14 = arith.constant 0.001953125 : f32
    %15 = vector.broadcast %cst_14 : f32 to vector<1x64xf32>
    %16 = arith.mulf %14, %15 : vector<1x64xf32>
    %cst_15 = arith.constant dense<0.000000e+00> : vector<1x64xf32>
    %17 = tpu.matmul %13, %2, %cst_15 {dimension_numbers = #tpu.dot_dimension_numbers<[1], [0], [0], [1], [0, 0, 1, 1], [], []>} : vector<1x64xf32>, vector<64x64xf32>, vector<1x64xf32> -> vector<1x64xf32>
    %cst_16 = arith.constant 0.001953125 : f32
    %18 = vector.broadcast %cst_16 : f32 to vector<1x64xf32>
    %19 = arith.mulf %17, %18 : vector<1x64xf32>
    %20 = arith.mulf %16, %16 : vector<1x64xf32>
    %21 = arith.subf %19, %20 : vector<1x64xf32>
    %cst_17 = arith.constant 0.000000e+00 : f32
    %22 = vector.broadcast %cst_17 : f32 to vector<1x64xf32>
    %23 = arith.maximumf %21, %22 : vector<1x64xf32>
    %cst_18 = arith.constant 9.99999974E-6 : f32
    %24 = vector.broadcast %cst_18 : f32 to vector<1x64xf32>
    %25 = arith.addf %23, %24 : vector<1x64xf32>
    %26 = math.rsqrt %25 : vector<1x64xf32>
    %27 = arith.mulf %7, %26 : vector<1x64xf32>
    %28 = arith.mulf %16, %27 : vector<1x64xf32>
    %29 = arith.subf %8, %28 : vector<1x64xf32>
    %30 = vector.broadcast %27 : vector<1x64xf32> to vector<32x64xf32>
    %31 = arith.mulf %6, %30 : vector<32x64xf32>
    %32 = vector.broadcast %29 : vector<1x64xf32> to vector<32x64xf32>
    %33 = arith.addf %31, %32 : vector<32x64xf32>
    %cst_19 = arith.constant 0.000000e+00 : f32
    %34 = vector.broadcast %cst_19 : f32 to vector<32x64xf32>
    %35 = arith.maximumf %33, %34 : vector<32x64xf32>
    %36 = arith.truncf %35 : vector<32x64xf32> to vector<32x64xbf16>
    %c1 = arith.constant 1 : index
    %c0_20 = arith.constant 0 : index
    %c0_21 = arith.constant 0 : index
    %37 = vector.load %arg3[%c1, %c0_20, %c0_21] : memref<3x64x64xf32, #tpu.memory_space<vmem>>, vector<1x64x64xf32>
    %38 = vector.shape_cast %37 : vector<1x64x64xf32> to vector<64x64xf32>
    %39 = arith.truncf %38 : vector<64x64xf32> to vector<64x64xbf16>
    %cst_22 = arith.constant dense<0.000000e+00> : vector<32x64xf32>
    %40 = tpu.matmul %36, %39, %cst_22 {dimension_numbers = #tpu.dot_dimension_numbers<[1], [0], [0], [1], [0, 0, 1, 1], [], []>} : vector<32x64xbf16>, vector<64x64xbf16>, vector<32x64xf32> -> vector<32x64xf32>
    %c0_23 = arith.constant 0 : index
    %c0_24 = arith.constant 0 : index
    %c0_25 = arith.constant 0 : index
    %41 = vector.load %arg4[%c0_23, %c0_24, %c0_25] : memref<2x32x32xf32, #tpu.memory_space<vmem>>, vector<1x32x32xf32>
    %42 = vector.shape_cast %41 : vector<1x32x32xf32> to vector<32x32xf32>
    %43 = arith.truncf %42 : vector<32x32xf32> to vector<32x32xbf16>
    %cst_26 = arith.constant dense<0.000000e+00> : vector<32x64xf32>
    %44 = tpu.matmul %43, %36, %cst_26 {dimension_numbers = #tpu.dot_dimension_numbers<[1], [0], [0], [1], [0, 0, 1, 1], [], []>} : vector<32x32xbf16>, vector<32x64xbf16>, vector<32x64xf32> -> vector<32x64xf32>
    %45 = arith.truncf %44 : vector<32x64xf32> to vector<32x64xbf16>
    %c0_27 = arith.constant 0 : index
    %c0_28 = arith.constant 0 : index
    %c0_29 = arith.constant 0 : index
    %46 = vector.load %arg3[%c0_27, %c0_28, %c0_29] : memref<3x64x64xf32, #tpu.memory_space<vmem>>, vector<1x64x64xf32>
    %47 = vector.shape_cast %46 : vector<1x64x64xf32> to vector<64x64xf32>
    %48 = arith.truncf %47 : vector<64x64xf32> to vector<64x64xbf16>
    %cst_30 = arith.constant dense<0.000000e+00> : vector<32x64xf32>
    %49 = tpu.matmul %45, %48, %cst_30 {dimension_numbers = #tpu.dot_dimension_numbers<[1], [0], [0], [1], [0, 0, 1, 1], [], []>} : vector<32x64xbf16>, vector<64x64xbf16>, vector<32x64xf32> -> vector<32x64xf32>
    %50 = arith.addf %40, %49 : vector<32x64xf32>
    %c1_31 = arith.constant 1 : index
    %c0_32 = arith.constant 0 : index
    %c0_33 = arith.constant 0 : index
    %51 = vector.load %arg4[%c1_31, %c0_32, %c0_33] : memref<2x32x32xf32, #tpu.memory_space<vmem>>, vector<1x32x32xf32>
    %52 = vector.shape_cast %51 : vector<1x32x32xf32> to vector<32x32xf32>
    %53 = arith.truncf %52 : vector<32x32xf32> to vector<32x32xbf16>
    %cst_34 = arith.constant dense<0.000000e+00> : vector<32x64xf32>
    %54 = tpu.matmul %53, %36, %cst_34 {dimension_numbers = #tpu.dot_dimension_numbers<[1], [0], [0], [1], [0, 0, 1, 1], [], []>} : vector<32x32xbf16>, vector<32x64xbf16>, vector<32x64xf32> -> vector<32x64xf32>
    %55 = arith.truncf %54 : vector<32x64xf32> to vector<32x64xbf16>
    %c2 = arith.constant 2 : index
    %c0_35 = arith.constant 0 : index
    %c0_36 = arith.constant 0 : index
    %56 = vector.load %arg3[%c2, %c0_35, %c0_36] : memref<3x64x64xf32, #tpu.memory_space<vmem>>, vector<1x64x64xf32>
    %57 = vector.shape_cast %56 : vector<1x64x64xf32> to vector<64x64xf32>
    %58 = arith.truncf %57 : vector<64x64xf32> to vector<64x64xbf16>
    %cst_37 = arith.constant dense<0.000000e+00> : vector<32x64xf32>
    %59 = tpu.matmul %55, %58, %cst_37 {dimension_numbers = #tpu.dot_dimension_numbers<[1], [0], [0], [1], [0, 0, 1, 1], [], []>} : vector<32x64xbf16>, vector<64x64xbf16>, vector<32x64xf32> -> vector<32x64xf32>
    %60 = arith.addf %50, %59 : vector<32x64xf32>
    %c0_38 = arith.constant 0 : index
    %c0_39 = arith.constant 0 : index
    %61 = vector.load %arg10[%c0_38, %c0_39] : memref<1x64xf32, #tpu.memory_space<vmem>>, vector<1x64xf32>
    %c0_40 = arith.constant 0 : index
    %c0_41 = arith.constant 0 : index
    %62 = vector.load %arg11[%c0_40, %c0_41] : memref<1x64xf32, #tpu.memory_space<vmem>>, vector<1x64xf32>
    %cst_42 = arith.constant dense<0.000000e+00> : vector<64xf32>
    %63 = vector.multi_reduction <add>, %60, %cst_42 [0] : vector<32x64xf32> to vector<64xf32>
    %64 = vector.shape_cast %63 : vector<64xf32> to vector<1x64xf32>
    %65 = arith.mulf %60, %60 : vector<32x64xf32>
    %cst_43 = arith.constant dense<0.000000e+00> : vector<64xf32>
    %66 = vector.multi_reduction <add>, %65, %cst_43 [0] : vector<32x64xf32> to vector<64xf32>
    %67 = vector.shape_cast %66 : vector<64xf32> to vector<1x64xf32>
    %cst_44 = arith.constant dense<0.000000e+00> : vector<1x64xf32>
    %68 = tpu.matmul %64, %2, %cst_44 {dimension_numbers = #tpu.dot_dimension_numbers<[1], [0], [0], [1], [0, 0, 1, 1], [], []>} : vector<1x64xf32>, vector<64x64xf32>, vector<1x64xf32> -> vector<1x64xf32>
    %cst_45 = arith.constant 0.001953125 : f32
    %69 = vector.broadcast %cst_45 : f32 to vector<1x64xf32>
    %70 = arith.mulf %68, %69 : vector<1x64xf32>
    %cst_46 = arith.constant dense<0.000000e+00> : vector<1x64xf32>
    %71 = tpu.matmul %67, %2, %cst_46 {dimension_numbers = #tpu.dot_dimension_numbers<[1], [0], [0], [1], [0, 0, 1, 1], [], []>} : vector<1x64xf32>, vector<64x64xf32>, vector<1x64xf32> -> vector<1x64xf32>
    %cst_47 = arith.constant 0.001953125 : f32
    %72 = vector.broadcast %cst_47 : f32 to vector<1x64xf32>
    %73 = arith.mulf %71, %72 : vector<1x64xf32>
    %74 = arith.mulf %70, %70 : vector<1x64xf32>
    %75 = arith.subf %73, %74 : vector<1x64xf32>
    %cst_48 = arith.constant 0.000000e+00 : f32
    %76 = vector.broadcast %cst_48 : f32 to vector<1x64xf32>
    %77 = arith.maximumf %75, %76 : vector<1x64xf32>
    %cst_49 = arith.constant 9.99999974E-6 : f32
    %78 = vector.broadcast %cst_49 : f32 to vector<1x64xf32>
    %79 = arith.addf %77, %78 : vector<1x64xf32>
    %80 = math.rsqrt %79 : vector<1x64xf32>
    %81 = arith.mulf %61, %80 : vector<1x64xf32>
    %82 = arith.mulf %70, %81 : vector<1x64xf32>
    %83 = arith.subf %62, %82 : vector<1x64xf32>
    %84 = vector.broadcast %81 : vector<1x64xf32> to vector<32x64xf32>
    %85 = arith.mulf %60, %84 : vector<32x64xf32>
    %86 = vector.broadcast %83 : vector<1x64xf32> to vector<32x64xf32>
    %87 = arith.addf %85, %86 : vector<32x64xf32>
    %cst_50 = arith.constant 0.000000e+00 : f32
    %88 = vector.broadcast %cst_50 : f32 to vector<32x64xf32>
    %89 = arith.maximumf %87, %88 : vector<32x64xf32>
    %90 = arith.truncf %89 : vector<32x64xf32> to vector<32x64xbf16>
    %c0_51 = arith.constant 0 : index
    %c0_52 = arith.constant 0 : index
    %91 = vector.load %arg5[%c0_51, %c0_52] : memref<64x256xf32, #tpu.memory_space<vmem>>, vector<64x256xf32>
    %92 = arith.truncf %91 : vector<64x256xf32> to vector<64x256xbf16>
    %cst_53 = arith.constant dense<0.000000e+00> : vector<32x256xf32>
    %93 = tpu.matmul %90, %92, %cst_53 {dimension_numbers = #tpu.dot_dimension_numbers<[1], [0], [0], [1], [0, 0, 1, 1], [], []>} : vector<32x64xbf16>, vector<64x256xbf16>, vector<32x256xf32> -> vector<32x256xf32>
    %c0_54 = arith.constant 0 : index
    %c0_55 = arith.constant 0 : index
    %94 = vector.load %arg12[%c0_54, %c0_55] : memref<1x256xf32, #tpu.memory_space<vmem>>, vector<1x256xf32>
    %c0_56 = arith.constant 0 : index
    %c0_57 = arith.constant 0 : index
    %95 = vector.load %arg13[%c0_56, %c0_57] : memref<1x256xf32, #tpu.memory_space<vmem>>, vector<1x256xf32>
    %cst_58 = arith.constant dense<0.000000e+00> : vector<256xf32>
    %96 = vector.multi_reduction <add>, %93, %cst_58 [0] : vector<32x256xf32> to vector<256xf32>
    %97 = vector.shape_cast %96 : vector<256xf32> to vector<1x256xf32>
    %98 = arith.mulf %93, %93 : vector<32x256xf32>
    %cst_59 = arith.constant dense<0.000000e+00> : vector<256xf32>
    %99 = vector.multi_reduction <add>, %98, %cst_59 [0] : vector<32x256xf32> to vector<256xf32>
    %100 = vector.shape_cast %99 : vector<256xf32> to vector<1x256xf32>
    %cst_60 = arith.constant dense<0.000000e+00> : vector<1x256xf32>
    %101 = tpu.matmul %97, %3, %cst_60 {dimension_numbers = #tpu.dot_dimension_numbers<[1], [0], [0], [1], [0, 0, 1, 1], [], []>} : vector<1x256xf32>, vector<256x256xf32>, vector<1x256xf32> -> vector<1x256xf32>
    %cst_61 = arith.constant 0.001953125 : f32
    %102 = vector.broadcast %cst_61 : f32 to vector<1x256xf32>
    %103 = arith.mulf %101, %102 : vector<1x256xf32>
    %cst_62 = arith.constant dense<0.000000e+00> : vector<1x256xf32>
    %104 = tpu.matmul %100, %3, %cst_62 {dimension_numbers = #tpu.dot_dimension_numbers<[1], [0], [0], [1], [0, 0, 1, 1], [], []>} : vector<1x256xf32>, vector<256x256xf32>, vector<1x256xf32> -> vector<1x256xf32>
    %cst_63 = arith.constant 0.001953125 : f32
    %105 = vector.broadcast %cst_63 : f32 to vector<1x256xf32>
    %106 = arith.mulf %104, %105 : vector<1x256xf32>
    %107 = arith.mulf %103, %103 : vector<1x256xf32>
    %108 = arith.subf %106, %107 : vector<1x256xf32>
    %cst_64 = arith.constant 0.000000e+00 : f32
    %109 = vector.broadcast %cst_64 : f32 to vector<1x256xf32>
    %110 = arith.maximumf %108, %109 : vector<1x256xf32>
    %cst_65 = arith.constant 9.99999974E-6 : f32
    %111 = vector.broadcast %cst_65 : f32 to vector<1x256xf32>
    %112 = arith.addf %110, %111 : vector<1x256xf32>
    %113 = math.rsqrt %112 : vector<1x256xf32>
    %114 = arith.mulf %94, %113 : vector<1x256xf32>
    %115 = arith.mulf %103, %114 : vector<1x256xf32>
    %116 = arith.subf %95, %115 : vector<1x256xf32>
    %117 = vector.broadcast %114 : vector<1x256xf32> to vector<32x256xf32>
    %118 = arith.mulf %93, %117 : vector<32x256xf32>
    %119 = vector.broadcast %116 : vector<1x256xf32> to vector<32x256xf32>
    %120 = arith.addf %118, %119 : vector<32x256xf32>
    %121 = arith.addf %120, %0 : vector<32x256xf32>
    %cst_66 = arith.constant 0.000000e+00 : f32
    %122 = vector.broadcast %cst_66 : f32 to vector<32x256xf32>
    %123 = arith.maximumf %121, %122 : vector<32x256xf32>
    %c0_67 = arith.constant 0 : index
    %c0_68 = arith.constant 0 : index
    %124 = vector.load %arg14[%c0_67, %c0_68] : memref<32x256xf32, #tpu.memory_space<vmem>>, vector<32x256xf32>
    tpu.vector_store %arg14[%c0_67, %c0_68], %123 {strides = array<i32>} : memref<32x256xf32, #tpu.memory_space<vmem>>, vector<32x256xf32>,
    return
  }
  func.func @transform_0(%arg0: i32) -> (i32, i32) {
    %c0_i32 = arith.constant 0 : i32
    %c0_i32_0 = arith.constant 0 : i32
    %c0_i32_1 = arith.constant 0 : i32
    return %c0_i32, %c0_i32_0 : i32, i32
  }
  func.func @transform_1(%arg0: i32) -> (i32, i32) {
    %c0_i32 = arith.constant 0 : i32
    %c0_i32_0 = arith.constant 0 : i32
    %c0_i32_1 = arith.constant 0 : i32
    return %c0_i32, %c0_i32_0 : i32, i32
  }
  func.func @transform_2(%arg0: i32) -> (i32, i32, i32) {
    %c0_i32 = arith.constant 0 : i32
    %c0_i32_0 = arith.constant 0 : i32
    %c0_i32_1 = arith.constant 0 : i32
    %c0_i32_2 = arith.constant 0 : i32
    return %c0_i32, %c0_i32_0, %c0_i32_1 : i32, i32, i32
  }
  func.func @transform_3(%arg0: i32) -> (i32, i32, i32) {
    %c0_i32 = arith.constant 0 : i32
    %c0_i32_0 = arith.constant 0 : i32
    %c0_i32_1 = arith.constant 0 : i32
    %c0_i32_2 = arith.constant 0 : i32
    return %c0_i32, %c0_i32_0, %c0_i32_1 : i32, i32, i32
  }
  func.func @transform_4(%arg0: i32) -> (i32, i32) {
    %c0_i32 = arith.constant 0 : i32
    %c0_i32_0 = arith.constant 0 : i32
    %c0_i32_1 = arith.constant 0 : i32
    return %c0_i32, %c0_i32_0 : i32, i32
  }
  func.func @transform_5(%arg0: i32) -> (i32, i32) {
    %c0_i32 = arith.constant 0 : i32
    %c0_i32_0 = arith.constant 0 : i32
    %c0_i32_1 = arith.constant 0 : i32
    return %c0_i32, %c0_i32_0 : i32, i32
  }
  func.func @transform_6(%arg0: i32) -> (i32, i32) {
    %c0_i32 = arith.constant 0 : i32
    %c0_i32_0 = arith.constant 0 : i32
    %c0_i32_1 = arith.constant 0 : i32
    return %c0_i32, %c0_i32_0 : i32, i32
  }
  func.func @transform_7(%arg0: i32) -> (i32, i32) {
    %c0_i32 = arith.constant 0 : i32
    %c0_i32_0 = arith.constant 0 : i32
    %c0_i32_1 = arith.constant 0 : i32
    return %c0_i32, %c0_i32_0 : i32, i32
  }
  func.func @transform_8(%arg0: i32) -> (i32, i32) {
    %c0_i32 = arith.constant 0 : i32
    %c0_i32_0 = arith.constant 0 : i32
    %c0_i32_1 = arith.constant 0 : i32
    return %c0_i32, %c0_i32_0 : i32, i32
  }
  func.func @transform_9(%arg0: i32) -> (i32, i32) {
    %c0_i32 = arith.constant 0 : i32
    %c0_i32_0 = arith.constant 0 : i32
    %c0_i32_1 = arith.constant 0 : i32
    return %c0_i32, %c0_i32_0 : i32, i32
  }
  func.func @transform_10(%arg0: i32) -> (i32, i32) {
    %c0_i32 = arith.constant 0 : i32
    %c0_i32_0 = arith.constant 0 : i32
    %c0_i32_1 = arith.constant 0 : i32
    return %c0_i32, %c0_i32_0 : i32, i32
  }
  func.func @transform_11(%arg0: i32) -> (i32, i32) {
    %c0_i32 = arith.constant 0 : i32
    %c0_i32_0 = arith.constant 0 : i32
    %c0_i32_1 = arith.constant 0 : i32
    return %c0_i32, %c0_i32_0 : i32, i32
  }
  func.func @transform_12(%arg0: i32) -> (i32, i32) {
    %c0_i32 = arith.constant 0 : i32
    %c0_i32_0 = arith.constant 0 : i32
    %c0_i32_1 = arith.constant 0 : i32
    return %c0_i32, %c0_i32_0 : i32, i32
  }
  func.func @transform_13(%arg0: i32) -> (i32, i32) {
    %c0_i32 = arith.constant 0 : i32
    %c0_i32_0 = arith.constant 0 : i32
    %c0_i32_1 = arith.constant 0 : i32
    return %c0_i32, %c0_i32_0 : i32, i32
  }
}

</mosaic_0001>

<bundles_post_ra>
// kernel: bottleneck_forward.1
= control target key start
LH: loop header
LB: loop body
LE: loop exit
PB: predicated region body
PF: predicated region fallthrough
CT: control target
= control target key end

     0   :  { %v1840_v63 = vmov 0.0|0.0   ;;  %vm1841_vm0 = vmmov 0   ;;  %vm228_vm1 = vcmask 523264   ;;  %vm460_vm2 = vcmask 261120   ;;  %s2723_s1 = inlined_call_operand.vmem [shape: f32[256,64], index: 1, kind: input, shape index: {}]   ;;  %s2724_s0 = inlined_call_operand.vmem [shape: f32[32,256], index: 0, kind: input, shape index: {}]   ;;  %s2725_s5 = inlined_call_operand.vmem [shape: f32[64,64], index: 5, kind: input, shape index: {}]   ;;  %s2726_s3 = inlined_call_operand.vmem [shape: f32[2,32,32], index: 3, kind: input, shape index: {}]   ;;  %s2727_s2 = inlined_call_operand.vmem [shape: f32[3,64,64], index: 2, kind: input, shape index: {}]   ;;  %s2728_s7 = inlined_call_operand.vmem [shape: f32[1,64], index: 7, kind: input, shape index: {}]   ;;  %s2729_s8 = inlined_call_operand.vmem [shape: f32[1,64], index: 8, kind: input, shape index: {}]   ;;  %s2730_s4 = inlined_call_operand.vmem [shape: f32[64,256], index: 4, kind: input, shape index: {}]   ;;  %s2731_s6 = inlined_call_operand.vmem [shape: f32[256,256], index: 6, kind: input, shape index: {}]   ;;  %s2732_s9 = inlined_call_operand.vmem [shape: f32[1,64], index: 9, kind: input, shape index: {}]   ;;  %s2733_s10 = inlined_call_operand.vmem [shape: f32[1,64], index: 10, kind: input, shape index: {}]   ;;  %s2734_s11 = inlined_call_operand.vmem [shape: f32[1,256], index: 11, kind: input, shape index: {}]   ;;  %s2735_s12 = inlined_call_operand.vmem [shape: f32[1,256], index: 12, kind: input, shape index: {}]   ;;  %s2736_s13 = inlined_call_operand.vmem [shape: f32[32,256], index: 13, kind: output, shape index: {}]  }
   0x1   :  { %v145_v0 = vld [vmem:[%s2723_s1 + $0x80] sm:$0xff]  ;;  %v146_v1 = vld [vmem:[%s2723_s1 + $0x88] sm:$0xff]  ;;  %v147_v5 = vld [vmem:[%s2723_s1 + $0x90] sm:$0xff]  ;;  %1635 = vmatprep.subr.bf16.mxu1 %v1840_v63 }
   0x2   :  { %v129_v2 = vld [vmem:[%s2723_s1] sm:$0xff]  ;;  %v169_v3 = vpack.c.bf16 %v146_v1, %v145_v0  ;;  %v130_v4 = vld [vmem:[%s2723_s1 + $0x8] sm:$0xff]  ;;  %v148_v6 = vld [vmem:[%s2723_s1 + $0x98] sm:$0xff] }
   0x3   :  { %v161_v7 = vpack.c.bf16 %v130_v4, %v129_v2  ;;  %v170_v8 = vpack.c.bf16 %v148_v6, %v147_v5  ;;  %v131_v9 = vld [vmem:[%s2723_s1 + $0x10] sm:$0xff]  ;;  %v132_v10 = vld [vmem:[%s2723_s1 + $0x18] sm:$0xff]  ;;  %v149_v11 = vld [vmem:[%s2723_s1 + $0xa0] sm:$0xff] }
   0x4   :  { %1417 = vmatprep.subr.bf16.mxu0 %v169_v3  ;;  %v150_v12 = vld [vmem:[%s2723_s1 + $0xa8] sm:$0xff]  ;;  %v162_v13 = vpack.c.bf16 %v132_v10, %v131_v9  ;;  %v133_v15 = vld [vmem:[%s2723_s1 + $0x20] sm:$0xff]  ;;  %v151_v17 = vld [vmem:[%s2723_s1 + $0xb0] sm:$0xff]  ;;  %v1842_v9 = vmov 0.0  }
   0x5   :  { %1418 = vmatpush3.bf16.msra.mxu0 %v161_v7  ;;  %v171_v14 = vpack.c.bf16 %v150_v12, %v149_v11  ;;  %v134_v16 = vld [vmem:[%s2723_s1 + $0x28] sm:$0xff]  ;;  %v152_v18 = vld [vmem:[%s2723_s1 + $0xb8] sm:$0xff]  ;;  %v135_v21 = vld [vmem:[%s2723_s1 + $0x30] sm:$0xff]  ;;  %1523 = vmatprep.mubr.msk.f32.mxu1 %vm1841_vm0, %v1842_v9 }
   0x6   :  { %1419 = vmatprep.subr.bf16.mxu0 %v170_v8  ;;  %v163_v19 = vpack.c.bf16 %v134_v16, %v133_v15  ;;  %v172_v20 = vpack.c.bf16 %v152_v18, %v151_v17  ;;  %v136_v22 = vld [vmem:[%s2723_s1 + $0x38] sm:$0xff]  ;;  %v153_v23 = vld [vmem:[%s2723_s1 + $0xc0] sm:$0xff]  ;;  %v154_v24 = vld [vmem:[%s2723_s1 + $0xc8] sm:$0xff] }
   0x7   :  { %v46_v25 = vld [vmem:[%s2724_s0 + $0x8] sm:$0xff]  ;;  %v48_v26 = vld [vmem:[%s2724_s0 + $0x18] sm:$0xff]  ;;  %v164_v27 = vpack.c.bf16 %v136_v22, %v135_v21  ;;  %v173_v29 = vpack.c.bf16 %v154_v24, %v153_v23  ;;  %v137_v30 = vld [vmem:[%s2723_s1 + $0x40] sm:$0xff] }
   0x8   :  { %v54_v28 = vpack.c.bf16 %v48_v26, %v46_v25  ;;  %v138_v31 = vld [vmem:[%s2723_s1 + $0x48] sm:$0xff]  ;;  %v155_v32 = vld [vmem:[%s2723_s1 + $0xd0] sm:$0xff]  ;;  %v156_v33 = vld [vmem:[%s2723_s1 + $0xd8] sm:$0xff] }
   0x9   :  { %1420 = vmatpush3.bf16.msra.mxu0 %v162_v13  ;;  %v165_v34 = vpack.c.bf16 %v138_v31, %v137_v30  ;;  %v174_v35 = vpack.c.bf16 %v156_v33, %v155_v32  ;;  %v139_v36 = vld [vmem:[%s2723_s1 + $0x50] sm:$0xff]  ;;  %v140_v37 = vld [vmem:[%s2723_s1 + $0x58] sm:$0xff]  ;;  %v157_v38 = vld [vmem:[%s2723_s1 + $0xe0] sm:$0xff] }
   0xa   :  { %1421 = vmatprep.subr.bf16.mxu0 %v171_v14  ;;  %209 = vmatprep.mubr.bf16.mxu0 %v54_v28  ;;  %v158_v39 = vld [vmem:[%s2723_s1 + $0xe8] sm:$0xff]  ;;  %v166_v40 = vpack.c.bf16 %v140_v37, %v139_v36  ;;  %v141_v42 = vld [vmem:[%s2723_s1 + $0x60] sm:$0xff]  ;;  %v159_v44 = vld [vmem:[%s2723_s1 + $0xf0] sm:$0xff] }
   0xb   :  { %v175_v41 = vpack.c.bf16 %v158_v39, %v157_v38  ;;  %v142_v43 = vld [vmem:[%s2723_s1 + $0x68] sm:$0xff]  ;;  %v160_v45 = vld [vmem:[%s2723_s1 + $0xf8] sm:$0xff]  ;;  %v143_v48 = vld [vmem:[%s2723_s1 + $0x70] sm:$0xff] }
   0xc   :  { %v167_v46 = vpack.c.bf16 %v142_v43, %v141_v42  ;;  %v176_v47 = vpack.c.bf16 %v160_v45, %v159_v44  ;;  %v144_v49 = vld [vmem:[%s2723_s1 + $0x78] sm:$0xff]  ;;  %v45_v51 = vld [vmem:[%s2724_s0] sm:$0xff]  ;;  %v47_v52 = vld [vmem:[%s2724_s0 + $0x10] sm:$0xff] }
   0xd   :  { %1422 = vmatpush3.bf16.msra.mxu0 %v163_v19  ;;  %v168_v50 = vpack.c.bf16 %v144_v49, %v143_v48  ;;  %v50_v53 = vld [vmem:[%s2724_s0 + $0x28] sm:$0xff]  ;;  %v52_v54 = vld [vmem:[%s2724_s0 + $0x38] sm:$0xff]  ;;  %v53_v55 = vpack.c.bf16 %v47_v52, %v45_v51  ;;  %v49_v57 = vld [vmem:[%s2724_s0 + $0x20] sm:$0xff] }
   0xe   :  { %1423 = vmatprep.subr.bf16.mxu0 %v172_v20  ;;  %v56_v56 = vpack.c.bf16 %v52_v54, %v50_v53  ;;  %v51_v58 = vld [vmem:[%s2724_s0 + $0x30] sm:$0xff]  ;;  %v57_v60 = vld [vmem:[%s2725_s5] sm:$0xff]  ;;  %v58_v61 = vld [vmem:[%s2725_s5 + $0x8] sm:$0xff] }
   0xf   :  { %v55_v59 = vpack.c.bf16 %v51_v58, %v49_v57  ;;  %v2041_v62 = vpack.c.bf16 %v58_v61, %v57_v60  ;;  %v59_v0 = vld [vmem:[%s2725_s5 + $0x10] sm:$0xff]  ;;  %v60_v1 = vld [vmem:[%s2725_s5 + $0x18] sm:$0xff]  ;;  %v61_v3 = vld [vmem:[%s2725_s5 + $0x20] sm:$0xff] }
  0x10   :  { %v2052_v2 = vpack.c.bf16 %v60_v1, %v59_v0  ;;  %v62_v4 = vld [vmem:[%s2725_s5 + $0x28] sm:$0xff]  ;;  %v63_v6 = vld [vmem:[%s2725_s5 + $0x30] sm:$0xff]  ;;  %v64_v7 = vld [vmem:[%s2725_s5 + $0x38] sm:$0xff] }
  0x11   :  { %1424 = vmatpush3.bf16.msra.mxu0 %v164_v27  ;;  %1637 = vmatpush3.bf16.msra.mxu1 %v2041_v62  ;;  %v2062_v5 = vpack.c.bf16 %v62_v4, %v61_v3  ;;  %v2072_v8 = vpack.c.bf16 %v64_v7, %v63_v6  ;;  %v454_v52 = vld [vmem:[%s2726_s3] sm:$0xff]  ;;  %v455_v53 = vld [vmem:[%s2726_s3 + $0x8] sm:$0xff]  ;;  %v520_v57 = vld [vmem:[%s2727_s2 + $0x10] sm:$0xff] }
  0x12   :  { %1425 = vmatprep.subr.bf16.mxu0 %v173_v29  ;;  %1638 = vmatprep.subr.bf16.mxu1 %v1840_v63  ;;  %v458_v54 = vpack.c.bf16 %v455_v53, %v454_v52  ;;  %v522_v61 = vld [vmem:[%s2727_s2 + $0x20] sm:$0xff]  ;;  %v523_v0 = vld [vmem:[%s2727_s2 + $0x28] sm:$0xff] }
  0x13   :  { %v528_v1 = vpack.c.bf16 %v523_v0, %v522_v61  ;;  %v1383_v53 = vld [vmem:[%s2727_s2 + $0x40] sm:$0xff] }
  0x15   :  { %1426 = vmatpush3.bf16.msra.mxu0 %v165_v34  ;;  %1640 = vmatpush3.bf16.msra.mxu1 %v2052_v2 }
  0x16   :  { %1427 = vmatprep.subr.bf16.mxu0 %v174_v35  ;;  %1641 = vmatprep.subr.bf16.mxu1 %v1840_v63 }
  0x19   :  { %1428 = vmatpush3.bf16.msra.mxu0 %v166_v40  ;;  %1643 = vmatpush3.bf16.msra.mxu1 %v2062_v5 }
  0x1a   :  { %1429 = vmatprep.subr.bf16.mxu0 %v175_v41  ;;  %1644 = vmatprep.subr.bf16.mxu1 %v1840_v63 }
  0x1d   :  { %1430 = vmatpush3.bf16.msra.mxu0 %v167_v46  ;;  %1646 = vmatpush3.bf16.msra.mxu1 %v2072_v8 }
  0x1e   :  { %1431 = vmatprep.subr.bf16.mxu0 %v176_v47  ;;  %1647 = vmatprep.subr.bf16.mxu1 %v1840_v63 }
  0x21   :  { %1432 = vmatpush3.bf16.msra.mxu0 %v168_v50 }
  0x24   :  { %210 = vmatmul.mubr.bf16.vlgmr.msra.gmra.mrb[0].mxu0 %v53_v55  ;;  %v518_v55 = vld [vmem:[%s2727_s2] sm:$0xff] }
  0x25   :  { %217 = vmatprep.mubr.bf16.mxu0 %v56_v56  ;;  %v519_v56 = vld [vmem:[%s2727_s2 + $0x8] sm:$0xff] }
  0x26   :  { %v526_v58 = vpack.c.bf16 %v519_v56, %v518_v55 }
  0x28   :  { %1553 = vmatprep.subr.bf16.mxu0 %v526_v58 }
  0x29   :  { %1554 = vmatpush3.bf16.msra.mxu0 %v526_v58 }
  0x2c   :  { %218 = vmatmul.mubr.bf16.gmra.mrb[4].mxu0 %v55_v59  ;;  %v521_v59 = vld [vmem:[%s2727_s2 + $0x18] sm:$0xff] }
  0x2d   :  { %v527_v60 = vpack.c.bf16 %v521_v59, %v520_v57  ;;  %v1385_v59 = vld [vmem:[%s2727_s2 + $0x50] sm:$0xff] }
  0x2f   :  { %1555 = vmatprep.subr.bf16.mxu0 %v527_v60 }
  0x30   :  { %1556 = vmatpush3.bf16.msra.mxu0 %v527_v60  ;;  %v1386_v60 = vld [vmem:[%s2727_s2 + $0x58] sm:$0xff] }
  0x31   :  { %1557 = vmatprep.subr.bf16.mxu0 %v528_v1 }
  0x34   :  { %1558 = vmatpush3.bf16.msra.mxu0 %v528_v1 }
  0xf7   :  { %v1433_v10 = vpop.f32.mrb[0].mxu0 }
  0xf8   :  { %v1434_v11 = vpop.f32.mrb[1].mxu0 }
  0xf9   :  { %v2078_v12 = vadd.f32 %v1434_v11, %v1433_v10  ;;  %v1436_v13 = vpop.f32.mrb[2].mxu0 }
  0xfa   :  { %v1437_v14 = vpop.f32.mrb[3].mxu0 }
  0xfb   :  { %v2080_v15 = vadd.f32 %v1437_v14, %v1436_v13  ;;  %v242_v17 = vmul.f32 %v2078_v12, %v2078_v12  ;;  %v229_v21 = vsel %vm228_vm1, %v2078_v12, 0.0 }
  0xfd   :  { %v243_v16 = vmul.f32 %v2080_v15, %v2080_v15  ;;  %v230_v18 = vsel %vm228_vm1, %v2080_v15, 0.0  ;;  %v246_v27 = vsel %vm228_vm1, %v242_v17, 0.0 }
  0xfe   :  { %v231_v25 = vadd.f32 %v230_v18, %v229_v21  ;;  %v416_v18 = vlaneseq }
  0xff   :  { %v1439_v19 = vpop.f32.mrb[4].mxu0  ;;  %v247_v22 = vsel %vm228_vm1, %v243_v16, 0.0 }
 0x100   :  { %v1440_v20 = vpop.f32.mrb[5].mxu0  ;;  %v248_v31 = vadd.f32 %v247_v22, %v246_v27 }
 0x101   :  { %v2091_v23 = vadd.f32 %v1440_v20, %v1439_v19  ;;  %v1442_v24 = vpop.f32.mrb[6].mxu0  ;;  %v2142_v19 = vshrl.u32 %v416_v18, 7  ;;  %v226_v20 = vld [vmem:[%s2728_s7] sm:$0x1] }
 0x102   :  { %v1443_v26 = vpop.f32.mrb[7].mxu0 }
 0x103   :  { %v232_v28 = vsel %vm228_vm1, %v2091_v23, 0.0  ;;  %v244_v29 = vmul.f32 %v2091_v23, %v2091_v23  ;;  %v2098_v30 = vadd.f32 %v1443_v26, %v1442_v24  ;;  %v2148_v21 = vsub.s32 0, %v2142_v19 }
 0x104   :  { %v233_v32 = vadd.f32 %v232_v28, %v231_v25  ;;  %v227_v25 = vld [vmem:[%s2729_s8] sm:$0x1] }
 0x105   :  { %v249_v33 = vsel %vm228_vm1, %v244_v29, 0.0  ;;  %v234_v34 = vsel %vm228_vm1, %v2098_v30, 0.0  ;;  %v245_v35 = vmul.f32 %v2098_v30, %v2098_v30 }
 0x106   :  { %v250_v36 = vadd.f32 %v249_v33, %v248_v31  ;;  %v235_v37 = vadd.f32 %v234_v34, %v233_v32 }
 0x107   :  { %v251_v38 = vsel %vm228_vm1, %v245_v35, 0.0 }
 0x108   :  { %v236_v39 = vrot.slane %v235_v37, 4  ;;  %v252_v41 = vadd.f32 %v251_v38, %v250_v36 }
 0x10a   :  { %v237_v40 = vadd.f32 %v236_v39, %v235_v37  ;;  %v253_v43 = vrot.slane %v252_v41, 4 }
 0x10c   :  { %v238_v42 = vrot.slane %v237_v40, 2  ;;  %v254_v46 = vadd.f32 %v253_v43, %v252_v41 }
 0x10e   :  { %v239_v44 = vadd.f32 %v238_v42, %v237_v40  ;;  %v255_v48 = vrot.slane %v254_v46, 2 }
 0x110   :  { %v240_v45 = vrot.slane %v239_v44, 1  ;;  %v256_v49 = vadd.f32 %v255_v48, %v254_v46  ;;  %v1400_v48 = vld [vmem:[%s2726_s3 + $0x38] sm:$0xff] }
 0x112   :  { %v241_v47 = vadd.f32 %v240_v45, %v239_v44  ;;  %v257_v50 = vrot.slane %v256_v49, 1 }
 0x114   :  { %1524 = vmatmul.mubr.msk.f32.vlgmr.msra.gmra.mrb[0].mxu1 %vm228_vm1, %v241_v47  ;;  %v258_v51 = vadd.f32 %v257_v50, %v256_v49  ;;  %v1399_v47 = vld [vmem:[%s2726_s3 + $0x30] sm:$0xff] }
 0x115   :  { %1649 = vmatpush3.bf16.msra.mxu1 %v2041_v62  ;;  %1542 = vmatprep.mubr.msk.f32.mxu1 %vm1841_vm0, %v1842_v9  ;;  %v646_v49 = vpack.c.bf16 %v1400_v48, %v1399_v47  ;;  %v524_v50 = vld [vmem:[%s2727_s2 + $0x30] sm:$0xff] }
 0x116   :  { %1650 = vmatprep.subr.bf16.mxu1 %v1840_v63 }
 0x119   :  { %1652 = vmatpush3.bf16.msra.mxu1 %v2052_v2 }
 0x11a   :  { %1653 = vmatprep.subr.bf16.mxu1 %v1840_v63 }
 0x11d   :  { %1655 = vmatpush3.bf16.msra.mxu1 %v2062_v5 }
 0x11e   :  { %1656 = vmatprep.subr.bf16.mxu1 %v1840_v63 }
 0x121   :  { %1658 = vmatpush3.bf16.msra.mxu1 %v2072_v8 }
 0x124   :  { %1543 = vmatmul.mubr.msk.f32.vlgmr.msra.gmra.mrb[2].mxu1 %vm228_vm1, %v258_v51  ;;  %v525_v51 = vld [vmem:[%s2727_s2 + $0x38] sm:$0xff] }
 0x125   :  { %1549 = vmatprep.mubr.msk.bf16.mxu1 %vm460_vm2, %v458_v54  ;;  %v529_v52 = vpack.c.bf16 %v525_v51, %v524_v50  ;;  %v1384_v54 = vld [vmem:[%s2727_s2 + $0x48] sm:$0xff] }
 0x126   :  { %v450_v55 = vpack.c.bf16 %v1384_v54, %v1383_v53 }
 0x127   :  { %1559 = vmatprep.subr.bf16.mxu0 %v529_v52 }
 0x128   :  { %1560 = vmatpush3.bf16.msra.mxu0 %v529_v52 }
 0x129   :  { %1565 = vmatprep.subr.bf16.mxu0 %v450_v55 }
 0x1e7   :  { %v328_v3 = vpop.f32.mrb[0].mxu1 }
 0x1e8   :  { %v1525_v4 = vpop.f32.mrb[1].mxu1  ;;  %v332_v6 = vmul.f32 0.001953125, %v328_v3  ;;  %v451_v3 = vpack.c.bf16 %v1386_v60, %v1385_v59 }
 0x1e9   :  { %v1387_v4 = vld [vmem:[%s2727_s2 + $0x60] sm:$0xff] }
 0x1ea   :  { %v407_v10 = vmul.f32 %v332_v6, %v332_v6 }
 0x1f7   :  { %v402_v7 = vpop.f32.mrb[2].mxu1 }
 0x1f8   :  { %v406_v11 = vmul.f32 0.001953125, %v402_v7  ;;  %v1544_v13 = vpop.f32.mrb[3].mxu1 }
 0x1f9   :  { %v1389_v13 = vld [vmem:[%s2727_s2 + $0x70] sm:$0xff] }
 0x1fa   :  { %v408_v14 = vsub.f32 %v406_v11, %v407_v10 }
 0x1fc   :  { %v409_v16 = vmax.f32 %v408_v14, 0.0  ;;  %v1390_v14 = vld [vmem:[%s2727_s2 + $0x78] sm:$0xff] }
 0x1fe   :  { %v410_v17 = vadd.f32 1e-05, %v409_v16 }
 0x200   :  { %1824 = vrsqrt.f32 %v410_v17 }
 0x20a   :  { %v1825_v22 = vpop.eup %1824 }
 0x20b   :  { %v412_v24 = vmul.f32 %v1825_v22, %v226_v20  ;;  %v453_v22 = vpack.c.bf16 %v1390_v14, %v1389_v13  ;;  %v994_v13 = vld [vmem:[%s2730_s4 + $0x20] sm:$0xff]  ;;  %v996_v14 = vld [vmem:[%s2730_s4 + $0x30] sm:$0xff] }
 0x20d   :  { %v413_v26 = vmul.f32 %v412_v24, %v332_v6  ;;  %v419_v27 = vrot.slane %v412_v24, %v2148_v21  ;;  %v1388_v6 = vld [vmem:[%s2727_s2 + $0x68] sm:$0xff]  ;;  %v1403_v24 = vld [vmem:[%s2727_s2 + $0x80] sm:$0xff] }
 0x20e   :  { %v452_v10 = vpack.c.bf16 %v1388_v6, %v1387_v4 }
 0x20f   :  { %v414_v28 = vsub.f32 %v227_v25, %v413_v26  ;;  %v421_v29 = vmul.f32 %v2078_v12, %v419_v27  ;;  %v422_v32 = vmul.f32 %v2080_v15, %v419_v27  ;;  %v423_v33 = vmul.f32 %v2091_v23, %v419_v27  ;;  %v456_v12 = vld [vmem:[%s2726_s3 + $0x10] sm:$0xff]  ;;  %v457_v15 = vld [vmem:[%s2726_s3 + $0x18] sm:$0xff]  ;;  %v1397_v23 = vld [vmem:[%s2726_s3 + $0x20] sm:$0xff] }
 0x210   :  { %v424_v34 = vmul.f32 %v2098_v30, %v419_v27  ;;  %v1398_v30 = vld [vmem:[%s2726_s3 + $0x28] sm:$0xff]  ;;  %v459_v45 = vpack.c.bf16 %v457_v15, %v456_v12  ;;  %v1405_v27 = vld [vmem:[%s2727_s2 + $0x90] sm:$0xff] }
 0x211   :  { %v429_v31 = vrot.slane %v414_v28, %v2148_v21  ;;  %v645_v46 = vpack.c.bf16 %v1398_v30, %v1397_v23  ;;  %v1404_v25 = vld [vmem:[%s2727_s2 + $0x88] sm:$0xff]  ;;  %v1406_v28 = vld [vmem:[%s2727_s2 + $0x98] sm:$0xff] }
 0x212   :  { %v713_v26 = vpack.c.bf16 %v1404_v25, %v1403_v24  ;;  %v1000_v24 = vld [vmem:[%s2730_s4 + $0x50] sm:$0xff] }
 0x213   :  { %v431_v35 = vadd.f32 %v429_v31, %v421_v29  ;;  %v432_v36 = vadd.f32 %v429_v31, %v422_v32  ;;  %v433_v37 = vadd.f32 %v429_v31, %v423_v33  ;;  %v434_v38 = vadd.f32 %v429_v31, %v424_v34  ;;  %v1407_v31 = vld [vmem:[%s2727_s2 + $0xa0] sm:$0xff]  ;;  %v1408_v32 = vld [vmem:[%s2727_s2 + $0xa8] sm:$0xff]  ;;  %v1409_v34 = vld [vmem:[%s2727_s2 + $0xb0] sm:$0xff] }
 0x214   :  { %v714_v29 = vpack.c.bf16 %v1406_v28, %v1405_v27  ;;  %v715_v33 = vpack.c.bf16 %v1408_v32, %v1407_v31  ;;  %v1005_v27 = vld [vmem:[%s2730_s4 + $0x78] sm:$0xff]  ;;  %v1002_v28 = vld [vmem:[%s2730_s4 + $0x60] sm:$0xff]  ;;  %v1004_v31 = vld [vmem:[%s2730_s4 + $0x70] sm:$0xff]  ;;  %v1843_v32 = vmov 0  }
 0x215   :  { %v435_v39 = vmax.f32 %v431_v35, 0.0  ;;  %v436_v40 = vmax.f32 %v432_v36, 0.0  ;;  %v437_v41 = vmax.f32 %v433_v37, 0.0  ;;  %v438_v42 = vmax.f32 %v434_v38, 0.0  ;;  %v1410_v35 = vld [vmem:[%s2727_s2 + $0xb8] sm:$0xff] }
 0x216   :  { %v716_v36 = vpack.c.bf16 %v1410_v35, %v1409_v34  ;;  %v66_v34 = vld [vmem:[%s2731_s6 + $0x8] sm:$0xff]  ;;  %v68_v35 = vld [vmem:[%s2731_s6 + $0x18] sm:$0xff] }
 0x217   :  { %v439_v43 = vpack.c.bf16 %v436_v40, %v435_v39  ;;  %v2159_v44 = vpack.c.bf16 %v438_v42, %v437_v41 }
 0x219   :  { %1545 = vmatprep.subr.bf16.mxu1 %v439_v43 }
 0x21a   :  { %1546 = vmatpush3.bf16.msra.mxu1 %v439_v43 }
 0x21b   :  { %1547 = vmatprep.subr.bf16.mxu1 %v2159_v44 }
 0x21e   :  { %1548 = vmatpush3.bf16.msra.mxu1 %v2159_v44 }
 0x21f   :  { %1577 = vmatprep.subr.bf16.mxu1 %v439_v43 }
 0x221   :  { %1550 = vmatmul.mubr.msk.bf16.vlgmr.msra.gmra.mrb[4].mxu1 %vm460_vm2, %v459_v45 }
 0x222   :  { %1578 = vmatpush3.bf16.msra.mxu1 %v439_v43  ;;  %1581 = vmatprep.mubr.msk.bf16.mxu1 %vm460_vm2, %v645_v46 }
 0x223   :  { %1579 = vmatprep.subr.bf16.mxu1 %v2159_v44 }
 0x226   :  { %1580 = vmatpush3.bf16.msra.mxu1 %v2159_v44 }
 0x227   :  { %1659 = vmatprep.subr.bf16.mxu1 %v1840_v63 }
 0x229   :  { %1582 = vmatmul.mubr.msk.bf16.vlgmr.msra.gmra.mrb[8].mxu1 %vm460_vm2, %v646_v49 }
 0x22a   :  { %1661 = vmatpush3.bf16.msra.mxu1 %v2041_v62  ;;  %1613 = vmatprep.mubr.msk.f32.mxu1 %vm1841_vm0, %v1842_v9 }
 0x22b   :  { %1662 = vmatprep.subr.bf16.mxu1 %v1840_v63 }
 0x22e   :  { %1664 = vmatpush3.bf16.msra.mxu1 %v2052_v2 }
 0x22f   :  { %1665 = vmatprep.subr.bf16.mxu1 %v1840_v63 }
 0x232   :  { %1667 = vmatpush3.bf16.msra.mxu1 %v2062_v5 }
 0x233   :  { %1668 = vmatprep.subr.bf16.mxu1 %v1840_v63 }
 0x236   :  { %1670 = vmatpush3.bf16.msra.mxu1 %v2072_v8 }
 0x237   :  { %1671 = vmatprep.subr.bf16.mxu1 %v1840_v63 }
 0x2f4   :  { %v1551_v56 = vpop.f32.mrb[4].mxu1 }
 0x2f5   :  { %v501_v57 = vpop.f32.mrb[5].mxu1 }
 0x2f6   :  { %v1552_v58 = vpop.f32.mrb[6].mxu1 }
 0x2f7   :  { %v517_v61 = vpack.c.bf16 %v1552_v58, %v1551_v56  ;;  %v504_v0 = vpop.f32.mrb[7].mxu1 }
 0x2f8   :  { %v516_v1 = vpack.c.bf16 %v504_v0, %v501_v57 }
 0x2fa   :  { %1561 = vmatprep.mubr.msk.bf16.mxu0 %vm228_vm1, %v516_v1 }
 0x2fb   :  { %1562 = vmatmul.mubr.msk.bf16.vlgmr.msra.gmra.mrb[8].mxu0 %vm228_vm1, %v517_v61 }
 0x2fc   :  { %1566 = vmatpush3.bf16.msra.mxu0 %v450_v55  ;;  %1573 = vmatprep.mubr.msk.bf16.mxu0 %vm228_vm1, %v439_v43  ;;  %v1583_v7 = vpop.f32.mrb[8].mxu1 }
 0x2fd   :  { %1567 = vmatprep.subr.bf16.mxu0 %v451_v3  ;;  %v687_v11 = vpop.f32.mrb[9].mxu1 }
 0x2fe   :  { %v1584_v16 = vpop.f32.mrb[10].mxu1 }
 0x2ff   :  { %v703_v17 = vpack.c.bf16 %v1584_v16, %v1583_v7  ;;  %v690_v18 = vpop.f32.mrb[11].mxu1  ;;  %v995_v7 = vld [vmem:[%s2730_s4 + $0x28] sm:$0xff]  ;;  %v1008_v16 = vpack.c.bf16 %v996_v14, %v994_v13  ;;  %v96_v13 = vld [vmem:[%s2731_s6 + $0xf8] sm:$0xff] }
 0x300   :  { %1568 = vmatpush3.bf16.msra.mxu0 %v451_v3  ;;  %v702_v20 = vpack.c.bf16 %v690_v18, %v687_v11  ;;  %v1001_v18 = vld [vmem:[%s2730_s4 + $0x58] sm:$0xff] }
 0x301   :  { %1569 = vmatprep.subr.bf16.mxu0 %v452_v10 }
 0x304   :  { %1570 = vmatpush3.bf16.msra.mxu0 %v452_v10  ;;  %v997_v10 = vld [vmem:[%s2730_s4 + $0x38] sm:$0xff] }
 0x305   :  { %1571 = vmatprep.subr.bf16.mxu0 %v453_v22  ;;  %v1009_v11 = vpack.c.bf16 %v997_v10, %v995_v7  ;;  %v89_v7 = vld [vmem:[%s2731_s6 + $0xc0] sm:$0xff]  ;;  %v91_v10 = vld [vmem:[%s2731_s6 + $0xd0] sm:$0xff] }
 0x306   :  { %v2471_v14 = vpack.c.bf16 %v91_v10, %v89_v7 }
 0x308   :  { %1572 = vmatpush3.bf16.msra.mxu0 %v453_v22  ;;  %v998_v22 = vld [vmem:[%s2730_s4 + $0x40] sm:$0xff] }
 0x309   :  { %1585 = vmatprep.subr.bf16.mxu0 %v713_v26  ;;  %v1010_v25 = vpack.c.bf16 %v1000_v24, %v998_v22  ;;  %v100_v22 = vld [vmem:[%s2731_s6 + $0x118] sm:$0xff] }
 0x30b   :  { %1574 = vmatmul.mubr.msk.bf16.vlgmr.msra.gmra.mrb[8].mxu0 %vm228_vm1, %v2159_v44 }
 0x30c   :  { %1586 = vmatpush3.bf16.msra.mxu0 %v713_v26  ;;  %1593 = vmatprep.mubr.msk.bf16.mxu0 %vm228_vm1, %v702_v20  ;;  %v1003_v26 = vld [vmem:[%s2730_s4 + $0x68] sm:$0xff] }
 0x30d   :  { %1587 = vmatprep.subr.bf16.mxu0 %v714_v29 }
 0x310   :  { %1588 = vmatpush3.bf16.msra.mxu0 %v714_v29  ;;  %v1013_v29 = vpack.c.bf16 %v1005_v27, %v1003_v26  ;;  %v97_v26 = vld [vmem:[%s2731_s6 + $0x100] sm:$0xff]  ;;  %v99_v27 = vld [vmem:[%s2731_s6 + $0x110] sm:$0xff] }
 0x311   :  { %1589 = vmatprep.subr.bf16.mxu0 %v715_v33 }
 0x314   :  { %1590 = vmatpush3.bf16.msra.mxu0 %v715_v33  ;;  %v1012_v33 = vpack.c.bf16 %v1004_v31, %v1002_v28  ;;  %v102_v28 = vld [vmem:[%s2731_s6 + $0x128] sm:$0xff]  ;;  %v1717_v31 = vpack.c.bf16 %v99_v27, %v97_v26  ;;  %v117_v26 = vld [vmem:[%s2731_s6 + $0x1a0] sm:$0xff]  ;;  %v119_v27 = vld [vmem:[%s2731_s6 + $0x1b0] sm:$0xff] }
 0x315   :  { %1591 = vmatprep.subr.bf16.mxu0 %v716_v36 }
 0x318   :  { %1592 = vmatpush3.bf16.msra.mxu0 %v716_v36  ;;  %v65_v36 = vld [vmem:[%s2731_s6] sm:$0xff] }
 0x31b   :  { %1594 = vmatmul.mubr.msk.bf16.vlgmr.msra.gmra.mrb[8].mxu0 %vm228_vm1, %v703_v17  ;;  %v999_v17 = vld [vmem:[%s2730_s4 + $0x48] sm:$0xff] }
 0x31c   :  { %v1011_v20 = vpack.c.bf16 %v1001_v18, %v999_v17  ;;  %1052 = vmatprep.mubr.bf16.mxu0 %v1843_v32  ;;  %v93_v17 = vld [vmem:[%s2731_s6 + $0xe0] sm:$0xff]  ;;  %v95_v18 = vld [vmem:[%s2731_s6 + $0xf0] sm:$0xff] }
 0x31d   :  { %v2489_v24 = vpack.c.bf16 %v95_v18, %v93_v17  ;;  %v115_v18 = vld [vmem:[%s2731_s6 + $0x190] sm:$0xff] }
 0x3ee   :  { %v2258_v37 = vpop.f32.mrb[8].mxu0 }
 0x3ef   :  { %v2260_v38 = vpop.f32.mrb[9].mxu0  ;;  %v793_v42 = vmul.f32 %v2258_v37, %v2258_v37  ;;  %v781_v23 = vsel %vm228_vm1, %v2258_v37, 0.0 }
 0x3f0   :  { %v791_v39 = vmul.f32 %v2260_v38, %v2260_v38  ;;  %v2264_v40 = vpop.f32.mrb[10].mxu0  ;;  %v778_v43 = vsel %vm228_vm1, %v2260_v38, 0.0 }
 0x3f1   :  { %v2266_v41 = vpop.f32.mrb[11].mxu0  ;;  %v794_v45 = vmul.f32 %v2264_v40, %v2264_v40  ;;  %v798_v49 = vsel %vm228_vm1, %v793_v42, 0.0  ;;  %v783_v50 = vsel %vm228_vm1, %v2264_v40, 0.0  ;;  %v67_v42 = vld [vmem:[%s2731_s6 + $0x10] sm:$0xff] }
 0x3f2   :  { %v779_v44 = vsel %vm228_vm1, %v2266_v41, 0.0  ;;  %v792_v12 = vmul.f32 %v2266_v41, %v2266_v41  ;;  %v795_v30 = vsel %vm228_vm1, %v791_v39, 0.0  ;;  %v1683_v39 = vpack.c.bf16 %v68_v35, %v66_v34 }
 0x3f3   :  { %v780_v15 = vadd.f32 %v779_v44, %v778_v43  ;;  %v800_v53 = vsel %vm228_vm1, %v794_v45, 0.0  ;;  %v70_v43 = vld [vmem:[%s2731_s6 + $0x28] sm:$0xff]  ;;  %v72_v44 = vld [vmem:[%s2731_s6 + $0x38] sm:$0xff] }
 0x3f4   :  { %v796_v46 = vsel %vm228_vm1, %v792_v12, 0.0  ;;  %v2364_v12 = vpack.c.bf16 %v67_v42, %v65_v36  ;;  %v74_v45 = vld [vmem:[%s2731_s6 + $0x48] sm:$0xff] }
 0x3f5   :  { %v782_v47 = vadd.f32 %v781_v23, %v780_v15  ;;  %v797_v48 = vadd.f32 %v796_v46, %v795_v30  ;;  %v2366_v15 = vpack.c.bf16 %v72_v44, %v70_v43  ;;  %v69_v23 = vld [vmem:[%s2731_s6 + $0x20] sm:$0xff]  ;;  %v71_v30 = vld [vmem:[%s2731_s6 + $0x30] sm:$0xff]  ;;  %v76_v46 = vld [vmem:[%s2731_s6 + $0x58] sm:$0xff] }
 0x3f7   :  { %v784_v51 = vadd.f32 %v783_v50, %v782_v47  ;;  %v799_v52 = vadd.f32 %v798_v49, %v797_v48  ;;  %v2381_v47 = vpack.c.bf16 %v71_v30, %v69_v23  ;;  %v2384_v48 = vpack.c.bf16 %v76_v46, %v74_v45  ;;  %v73_v49 = vld [vmem:[%s2731_s6 + $0x40] sm:$0xff]  ;;  %v75_v50 = vld [vmem:[%s2731_s6 + $0x50] sm:$0xff] }
 0x3f8   :  { %v776_v46 = vld [vmem:[%s2732_s9] sm:$0x1] }
 0x3f9   :  { %v785_v54 = vrot.slane %v784_v51, 4  ;;  %v801_v55 = vadd.f32 %v800_v53, %v799_v52  ;;  %v80_v52 = vld [vmem:[%s2731_s6 + $0x78] sm:$0xff]  ;;  %v2399_v53 = vpack.c.bf16 %v75_v50, %v73_v49 }
 0x3fb   :  { %v786_v56 = vadd.f32 %v785_v54, %v784_v51  ;;  %v802_v59 = vrot.slane %v801_v55, 4  ;;  %v78_v51 = vld [vmem:[%s2731_s6 + $0x68] sm:$0xff] }
 0x3fc   :  { %v2402_v54 = vpack.c.bf16 %v80_v52, %v78_v51  ;;  %v777_v51 = vld [vmem:[%s2733_s10] sm:$0x1] }
 0x3fd   :  { %v787_v57 = vrot.slane %v786_v56, 2  ;;  %v803_v61 = vadd.f32 %v802_v59, %v801_v55  ;;  %v77_v55 = vld [vmem:[%s2731_s6 + $0x60] sm:$0xff] }
 0x3ff   :  { %v788_v58 = vadd.f32 %v787_v57, %v786_v56  ;;  %v804_v1 = vrot.slane %v803_v61, 2  ;;  %v79_v56 = vld [vmem:[%s2731_s6 + $0x70] sm:$0xff]  ;;  %v82_v57 = vld [vmem:[%s2731_s6 + $0x88] sm:$0xff] }
 0x400   :  { %v2417_v59 = vpack.c.bf16 %v79_v56, %v77_v55 }
 0x401   :  { %v789_v60 = vrot.slane %v788_v58, 1  ;;  %v805_v3 = vadd.f32 %v804_v1, %v803_v61  ;;  %v81_v61 = vld [vmem:[%s2731_s6 + $0x80] sm:$0xff]  ;;  %v86_v1 = vld [vmem:[%s2731_s6 + $0xa8] sm:$0xff] }
 0x403   :  { %v790_v0 = vadd.f32 %v789_v60, %v788_v58  ;;  %v806_v4 = vrot.slane %v805_v3, 1  ;;  %v84_v58 = vld [vmem:[%s2731_s6 + $0x98] sm:$0xff] }
 0x404   :  { %v2420_v60 = vpack.c.bf16 %v84_v58, %v82_v57 }
 0x405   :  { %1614 = vmatmul.mubr.msk.f32.vlgmr.msra.gmra.mrb[12].mxu1 %vm228_vm1, %v790_v0  ;;  %v807_v6 = vadd.f32 %v806_v4, %v805_v3  ;;  %v83_v0 = vld [vmem:[%s2731_s6 + $0x90] sm:$0xff]  ;;  %v88_v3 = vld [vmem:[%s2731_s6 + $0xb8] sm:$0xff] }
 0x406   :  { %1673 = vmatpush3.bf16.msra.mxu1 %v2041_v62  ;;  %1632 = vmatprep.mubr.msk.f32.mxu1 %vm1841_vm0, %v1842_v9  ;;  %v991_v62 = vld [vmem:[%s2730_s4 + $0x8] sm:$0xff]  ;;  %v2435_v4 = vpack.c.bf16 %v83_v0, %v81_v61 }
 0x407   :  { %1674 = vmatprep.subr.bf16.mxu1 %v1840_v63 }
 0x40a   :  { %1676 = vmatpush3.bf16.msra.mxu1 %v2052_v2  ;;  %v993_v2 = vld [vmem:[%s2730_s4 + $0x18] sm:$0xff] }
 0x40b   :  { %1677 = vmatprep.subr.bf16.mxu1 %v1840_v63  ;;  %v1007_v9 = vpack.c.bf16 %v993_v2, %v991_v62  ;;  %v85_v62 = vld [vmem:[%s2731_s6 + $0xa0] sm:$0xff]  ;;  %v87_v2 = vld [vmem:[%s2731_s6 + $0xb0] sm:$0xff] }
 0x40d   :  { %1020 = vmatprep.subr.bf16.mxu0 %v1007_v9  ;;  %v90_v9 = vld [vmem:[%s2731_s6 + $0xc8] sm:$0xff] }
 0x40e   :  { %1679 = vmatpush3.bf16.msra.mxu1 %v2062_v5  ;;  %v990_v5 = vld [vmem:[%s2730_s4] sm:$0xff] }
 0x40f   :  { %1680 = vmatprep.subr.bf16.mxu1 %v1840_v63  ;;  %v992_v63 = vld [vmem:[%s2730_s4 + $0x10] sm:$0xff] }
 0x412   :  { %1682 = vmatpush3.bf16.msra.mxu1 %v2072_v8  ;;  %v1006_v8 = vpack.c.bf16 %v992_v63, %v990_v5  ;;  %v92_v5 = vld [vmem:[%s2731_s6 + $0xd8] sm:$0xff]  ;;  %v2453_v63 = vpack.c.bf16 %v87_v2, %v85_v62 }
 0x413   :  { %1684 = vmatprep.subr.bf16.mxu1 %v1683_v39 }
 0x414   :  { %1021 = vmatpush1.bf16.msra.mxu0 %v1006_v8  ;;  %v2456_v8 = vpack.c.bf16 %v92_v5, %v90_v9 }
 0x415   :  { %1633 = vmatmul.mubr.msk.f32.vlgmr.msra.gmra.mrb[14].mxu1 %vm228_vm1, %v807_v6  ;;  %1022 = vmatprep.subr.bf16.mxu0 %v1009_v11  ;;  %v2438_v6 = vpack.c.bf16 %v88_v3, %v86_v1  ;;  %v94_v11 = vld [vmem:[%s2731_s6 + $0xe8] sm:$0xff] }
 0x416   :  { %1686 = vmatpush1.bf16.msra.mxu1 %v2364_v12 }
 0x417   :  { %1688 = vmatprep.subr.bf16.mxu1 %v2366_v15 }
 0x418   :  { %1023 = vmatpush1.bf16.msra.mxu0 %v1008_v16  ;;  %v2474_v16 = vpack.c.bf16 %v96_v13, %v94_v11 }
 0x419   :  { %1024 = vmatprep.subr.bf16.mxu0 %v1011_v20  ;;  %v98_v20 = vld [vmem:[%s2731_s6 + $0x108] sm:$0xff] }
 0x41a   :  { %1690 = vmatpush1.bf16.msra.mxu1 %v2381_v47 }
 0x41b   :  { %1692 = vmatprep.subr.bf16.mxu1 %v2384_v48 }
 0x41c   :  { %1025 = vmatpush1.bf16.msra.mxu0 %v1010_v25  ;;  %v2492_v25 = vpack.c.bf16 %v100_v22, %v98_v20  ;;  %v118_v22 = vld [vmem:[%s2731_s6 + $0x1a8] sm:$0xff] }
 0x41d   :  { %1026 = vmatprep.subr.bf16.mxu0 %v1013_v29  ;;  %v104_v29 = vld [vmem:[%s2731_s6 + $0x138] sm:$0xff] }
 0x41e   :  { %1694 = vmatpush1.bf16.msra.mxu1 %v2399_v53 }
 0x41f   :  { %1696 = vmatprep.subr.bf16.mxu1 %v2402_v54 }
 0x420   :  { %1027 = vmatpush1.bf16.msra.mxu0 %v1012_v33  ;;  %v1719_v33 = vpack.c.bf16 %v104_v29, %v102_v28  ;;  %v1737_v28 = vpack.c.bf16 %v119_v27, %v117_v26  ;;  %v122_v29 = vld [vmem:[%s2731_s6 + $0x1c8] sm:$0xff] }
 0x421   :  { %1748 = vmatprep.subr.bf16.mxu0 %v1683_v39 }
 0x422   :  { %1698 = vmatpush1.bf16.msra.mxu1 %v2417_v59 }
 0x423   :  { %1700 = vmatprep.subr.bf16.mxu1 %v2420_v60 }
 0x426   :  { %1702 = vmatpush1.bf16.msra.mxu1 %v2435_v4 }
 0x427   :  { %1704 = vmatprep.subr.bf16.mxu1 %v2438_v6 }
 0x42a   :  { %1706 = vmatpush1.bf16.msra.mxu1 %v2453_v63 }
 0x42b   :  { %1708 = vmatprep.subr.bf16.mxu1 %v2456_v8 }
 0x42e   :  { %1710 = vmatpush1.bf16.msra.mxu1 %v2471_v14 }
 0x42f   :  { %1712 = vmatprep.subr.bf16.mxu1 %v2474_v16 }
 0x432   :  { %1714 = vmatpush1.bf16.msra.mxu1 %v2489_v24 }
 0x433   :  { %1716 = vmatprep.subr.bf16.mxu1 %v2492_v25 }
 0x436   :  { %1718 = vmatpush1.bf16.msra.mxu1 %v1717_v31 }
 0x437   :  { %1720 = vmatprep.subr.bf16.mxu1 %v1719_v33 }
 0x4d8   :  { %v877_v34 = vpop.f32.mrb[12].mxu1 }
 0x4d9   :  { %v1615_v35 = vpop.f32.mrb[13].mxu1  ;;  %v881_v36 = vmul.f32 0.001953125, %v877_v34  ;;  %v121_v34 = vld [vmem:[%s2731_s6 + $0x1c0] sm:$0xff] }
 0x4da   :  { %v123_v35 = vld [vmem:[%s2731_s6 + $0x1d0] sm:$0xff] }
 0x4db   :  { %v956_v42 = vmul.f32 %v881_v36, %v881_v36 }
 0x4e8   :  { %v951_v39 = vpop.f32.mrb[14].mxu1 }
 0x4e9   :  { %v955_v43 = vmul.f32 0.001953125, %v951_v39  ;;  %v1634_v44 = vpop.f32.mrb[15].mxu1  ;;  %v126_v39 = vld [vmem:[%s2731_s6 + $0x1e8] sm:$0xff] }
 0x4ea   :  { %v125_v44 = vld [vmem:[%s2731_s6 + $0x1e0] sm:$0xff] }
 0x4eb   :  { %v957_v23 = vsub.f32 %v955_v43, %v956_v42  ;;  %v128_v42 = vld [vmem:[%s2731_s6 + $0x1f8] sm:$0xff] }
 0x4ec   :  { %v1743_v43 = vpack.c.bf16 %v128_v42, %v126_v39 }
 0x4ed   :  { %v958_v30 = vmax.f32 %v957_v23, 0.0  ;;  %v127_v23 = vld [vmem:[%s2731_s6 + $0x1f0] sm:$0xff] }
 0x4ef   :  { %v959_v45 = vadd.f32 1e-05, %v958_v30  ;;  %v1745_v30 = vpack.c.bf16 %v127_v23, %v125_v44 }
 0x4f1   :  { %1826 = vrsqrt.f32 %v959_v45 }
 0x4fb   :  { %v1827_v49 = vpop.eup %1826 }
 0x4fc   :  { %v961_v50 = vmul.f32 %v1827_v49, %v776_v46 }
 0x4fe   :  { %v962_v52 = vmul.f32 %v961_v50, %v881_v36  ;;  %v968_v55 = vrot.slane %v961_v50, %v2148_v21  ;;  %v1741_v36 = vpack.c.bf16 %v123_v35, %v121_v34 }
 0x500   :  { %v963_v56 = vsub.f32 %v777_v51, %v962_v52  ;;  %v970_v57 = vmul.f32 %v968_v55, %v2260_v38  ;;  %v971_v58 = vmul.f32 %v968_v55, %v2266_v41  ;;  %v972_v61 = vmul.f32 %v2258_v37, %v968_v55  ;;  %v101_v37 = vld [vmem:[%s2731_s6 + $0x120] sm:$0xff]  ;;  %v103_v38 = vld [vmem:[%s2731_s6 + $0x130] sm:$0xff]  ;;  %v106_v41 = vld [vmem:[%s2731_s6 + $0x148] sm:$0xff] }
 0x501   :  { %v973_v0 = vmul.f32 %v2264_v40, %v968_v55  ;;  %v1721_v40 = vpack.c.bf16 %v103_v38, %v101_v37 }
 0x502   :  { %v978_v1 = vrot.slane %v963_v56, %v2148_v21 }
 0x503   :  { %1722 = vmatpush1.bf16.msra.mxu1 %v1721_v40 }
 0x504   :  { %v980_v3 = vadd.f32 %v978_v1, %v970_v57  ;;  %v981_v62 = vadd.f32 %v978_v1, %v971_v58  ;;  %v982_v2 = vadd.f32 %v978_v1, %v972_v61  ;;  %v983_v9 = vadd.f32 %v978_v1, %v973_v0 }
 0x506   :  { %v984_v5 = vmax.f32 %v980_v3, 0.0  ;;  %v985_v7 = vmax.f32 %v981_v62, 0.0  ;;  %v986_v10 = vmax.f32 %v982_v2, 0.0  ;;  %v987_v11 = vmax.f32 %v983_v9, 0.0 }
 0x508   :  { %v988_v13 = vpack.c.bf16 %v985_v7, %v984_v5  ;;  %v989_v17 = vpack.c.bf16 %v987_v11, %v986_v10 }
 0x50a   :  { %1415 = vmatmul.mubr.msk.bf16.vlgmr.msra.gmra.mrb[12].mxu0 %vm228_vm1, %v988_v13 }
 0x50b   :  { %1062 = vmatprep.mubr.bf16.mxu0 %v1843_v32  ;;  %1750 = vmatpush1.bf16.msra.mxu0 %v2364_v12  ;;  %v108_v32 = vld [vmem:[%s2731_s6 + $0x158] sm:$0xff] }
 0x50c   :  { %1752 = vmatprep.subr.bf16.mxu0 %v2366_v15  ;;  %v1723_v12 = vpack.c.bf16 %v108_v32, %v106_v41  ;;  %v105_v15 = vld [vmem:[%s2731_s6 + $0x140] sm:$0xff] }
 0x50e   :  { %1724 = vmatprep.subr.bf16.mxu1 %v1723_v12 }
 0x50f   :  { %1754 = vmatpush1.bf16.msra.mxu0 %v2381_v47  ;;  %v107_v47 = vld [vmem:[%s2731_s6 + $0x150] sm:$0xff] }
 0x510   :  { %1756 = vmatprep.subr.bf16.mxu0 %v2384_v48  ;;  %v1725_v48 = vpack.c.bf16 %v107_v47, %v105_v15 }
 0x512   :  { %1416 = vmatmul.mubr.msk.bf16.gmra.mrb[16].mxu0 %vm228_vm1, %v989_v17  ;;  %1726 = vmatpush1.bf16.msra.mxu1 %v1725_v48 }
 0x513   :  { %1758 = vmatpush1.bf16.msra.mxu0 %v2399_v53  ;;  %v110_v53 = vld [vmem:[%s2731_s6 + $0x168] sm:$0xff] }
 0x514   :  { %1760 = vmatprep.subr.bf16.mxu0 %v2402_v54  ;;  %v112_v54 = vld [vmem:[%s2731_s6 + $0x178] sm:$0xff] }
 0x517   :  { %1762 = vmatpush1.bf16.msra.mxu0 %v2417_v59  ;;  %v1727_v59 = vpack.c.bf16 %v112_v54, %v110_v53 }
 0x518   :  { %1764 = vmatprep.subr.bf16.mxu0 %v2420_v60  ;;  %v109_v60 = vld [vmem:[%s2731_s6 + $0x160] sm:$0xff] }
 0x519   :  { %1728 = vmatprep.subr.bf16.mxu1 %v1727_v59 }
 0x51b   :  { %1766 = vmatpush1.bf16.msra.mxu0 %v2435_v4  ;;  %v111_v4 = vld [vmem:[%s2731_s6 + $0x170] sm:$0xff] }
 0x51c   :  { %1768 = vmatprep.subr.bf16.mxu0 %v2438_v6  ;;  %v1729_v6 = vpack.c.bf16 %v111_v4, %v109_v60 }
 0x51e   :  { %1730 = vmatpush1.bf16.msra.mxu1 %v1729_v6 }
 0x51f   :  { %1770 = vmatpush1.bf16.msra.mxu0 %v2453_v63  ;;  %v114_v63 = vld [vmem:[%s2731_s6 + $0x188] sm:$0xff] }
 0x520   :  { %1772 = vmatprep.subr.bf16.mxu0 %v2456_v8  ;;  %v116_v8 = vld [vmem:[%s2731_s6 + $0x198] sm:$0xff] }
 0x523   :  { %1774 = vmatpush1.bf16.msra.mxu0 %v2471_v14  ;;  %v1731_v14 = vpack.c.bf16 %v116_v8, %v114_v63 }
 0x524   :  { %1776 = vmatprep.subr.bf16.mxu0 %v2474_v16  ;;  %v113_v16 = vld [vmem:[%s2731_s6 + $0x180] sm:$0xff] }
 0x525   :  { %v1733_v20 = vpack.c.bf16 %v115_v18, %v113_v16  ;;  %1732 = vmatprep.subr.bf16.mxu1 %v1731_v14 }
 0x527   :  { %1778 = vmatpush1.bf16.msra.mxu0 %v2489_v24  ;;  %1734 = vmatpush1.bf16.msra.mxu1 %v1733_v20  ;;  %v120_v24 = vld [vmem:[%s2731_s6 + $0x1b8] sm:$0xff] }
 0x528   :  { %1780 = vmatprep.subr.bf16.mxu0 %v2492_v25  ;;  %v1735_v25 = vpack.c.bf16 %v120_v24, %v118_v22 }
 0x52a   :  { %1736 = vmatprep.subr.bf16.mxu1 %v1735_v25 }
 0x52b   :  { %1782 = vmatpush1.bf16.msra.mxu0 %v1717_v31  ;;  %1738 = vmatpush1.bf16.msra.mxu1 %v1737_v28  ;;  %v124_v31 = vld [vmem:[%s2731_s6 + $0x1d8] sm:$0xff] }
 0x52c   :  { %1784 = vmatprep.subr.bf16.mxu0 %v1719_v33  ;;  %v1739_v33 = vpack.c.bf16 %v124_v31, %v122_v29 }
 0x52e   :  { %1740 = vmatprep.subr.bf16.mxu1 %v1739_v33 }
 0x52f   :  { %1786 = vmatpush1.bf16.msra.mxu0 %v1721_v40  ;;  %1742 = vmatpush1.bf16.msra.mxu1 %v1741_v36 }
 0x530   :  { %1788 = vmatprep.subr.bf16.mxu0 %v1723_v12  ;;  %1744 = vmatprep.subr.bf16.mxu1 %v1743_v43 }
 0x533   :  { %1790 = vmatpush1.bf16.msra.mxu0 %v1725_v48  ;;  %1746 = vmatpush1.bf16.msra.mxu1 %v1745_v30 }
 0x534   :  { %1792 = vmatprep.subr.bf16.mxu0 %v1727_v59 }
 0x537   :  { %1794 = vmatpush1.bf16.msra.mxu0 %v1729_v6 }
 0x538   :  { %1796 = vmatprep.subr.bf16.mxu0 %v1731_v14 }
 0x53b   :  { %1798 = vmatpush1.bf16.msra.mxu0 %v1733_v20 }
 0x53c   :  { %1800 = vmatprep.subr.bf16.mxu0 %v1735_v25 }
 0x53f   :  { %1802 = vmatpush1.bf16.msra.mxu0 %v1737_v28 }
 0x540   :  { %1804 = vmatprep.subr.bf16.mxu0 %v1739_v33 }
 0x543   :  { %1806 = vmatpush1.bf16.msra.mxu0 %v1741_v36 }
 0x544   :  { %1808 = vmatprep.subr.bf16.mxu0 %v1743_v43 }
 0x547   :  { %1810 = vmatpush1.bf16.msra.mxu0 %v1745_v30 }
 0x5dd   :  { %v2617_v45 = vpop.f32.mrb[12].mxu0 }
 0x5de   :  { %v2619_v46 = vpop.f32.mrb[13].mxu0  ;;  %v1093_v50 = vmul.f32 %v2617_v45, %v2617_v45 }
 0x5df   :  { %v2621_v49 = vpop.f32.mrb[14].mxu0  ;;  %v1094_v56 = vmul.f32 %v2619_v46, %v2619_v46 }
 0x5e0   :  { %v1075_v51 = vadd.f32 %v2621_v49, %v2617_v45  ;;  %v1095_v52 = vmul.f32 %v2621_v49, %v2621_v49  ;;  %v2629_v55 = vpop.f32.mrb[15].mxu0 }
 0x5e1   :  { %v1084_v57 = vadd.f32 %v2629_v55, %v2619_v46  ;;  %v1096_v58 = vmul.f32 %v2629_v55, %v2629_v55 }
 0x5e2   :  { %v1101_v61 = vadd.f32 %v1095_v52, %v1093_v50 }
 0x5e3   :  { %v1110_v0 = vadd.f32 %v1096_v58, %v1094_v56 }
 0x5e5   :  { %v2637_v1 = vpop.f32.mrb[16].mxu0 }
 0x5e6   :  { %v1076_v3 = vadd.f32 %v1075_v51, %v2637_v1  ;;  %v1097_v62 = vmul.f32 %v2637_v1, %v2637_v1  ;;  %v2642_v2 = vpop.f32.mrb[17].mxu0 }
 0x5e7   :  { %v1085_v9 = vadd.f32 %v1084_v57, %v2642_v2  ;;  %v1098_v5 = vmul.f32 %v2642_v2, %v2642_v2  ;;  %v2647_v7 = vpop.f32.mrb[18].mxu0 }
 0x5e8   :  { %v1102_v10 = vadd.f32 %v1101_v61, %v1097_v62  ;;  %v1077_v11 = vadd.f32 %v1076_v3, %v2647_v7  ;;  %v1099_v13 = vmul.f32 %v2647_v7, %v2647_v7  ;;  %v2652_v17 = vpop.f32.mrb[19].mxu0  ;;  %v1844_v61 = vmov 1966171168  }
 0x5e9   :  { %v1111_v37 = vadd.f32 %v1110_v0, %v1098_v5  ;;  %v1086_v38 = vadd.f32 %v1085_v9, %v2652_v17  ;;  %v1100_v40 = vmul.f32 %v2652_v17, %v2652_v17  ;;  %v1279_v0 = vunpack.c.l.s4 %v1844_v61 }
 0x5ea   :  { %v1078_v41 = vrot.slane %v1077_v11, 4  ;;  %v1103_v32 = vadd.f32 %v1102_v10, %v1099_v13  ;;  %v1073_v13 = vld [vmem:[%s2734_s11] sm:$0x3] }
 0x5eb   :  { %v1087_v12 = vrot.slane %v1086_v38, 4  ;;  %v1112_v15 = vadd.f32 %v1111_v37, %v1100_v40  ;;  %v1280_v3 = vunpack.c.0.s8 %v1279_v0 }
 0x5ec   :  { %v1079_v47 = vadd.f32 %v1078_v41, %v1077_v11  ;;  %v1104_v48 = vrot.slane %v1103_v32, 4 }
 0x5ed   :  { %v1088_v53 = vadd.f32 %v1087_v12, %v1086_v38  ;;  %v1113_v54 = vrot.slane %v1112_v15, 4  ;;  %v1283_v9 = vsub.s32 %v1280_v3, %v2142_v19  ;;  %v1301_v38 = vsub.s32 1, %v2142_v19 }
 0x5ee   :  { %v1080_v59 = vrot.slane %v1079_v47, 2  ;;  %v1105_v60 = vadd.f32 %v1104_v48, %v1103_v32 }
 0x5ef   :  { %v1089_v4 = vrot.slane %v1088_v53, 2  ;;  %v1114_v6 = vadd.f32 %v1113_v54, %v1112_v15 }
 0x5f0   :  { %v1081_v63 = vadd.f32 %v1080_v59, %v1079_v47  ;;  %v1106_v8 = vrot.slane %v1105_v60, 2 }
 0x5f1   :  { %v1090_v14 = vadd.f32 %v1089_v4, %v1088_v53  ;;  %v1115_v16 = vrot.slane %v1114_v6, 2 }
 0x5f2   :  { %v1107_v18 = vadd.f32 %v1106_v8, %v1105_v60  ;;  %v1082_v20 = vrot.slane %v1081_v63, 1 }
 0x5f3   :  { %v1091_v22 = vrot.slane %v1090_v14, 1  ;;  %v1116_v24 = vadd.f32 %v1115_v16, %v1114_v6 }
 0x5f4   :  { %v1108_v25 = vrot.slane %v1107_v18, 1  ;;  %v1083_v28 = vadd.f32 %v1082_v20, %v1081_v63 }
 0x5f5   :  { %v1092_v26 = vadd.f32 %v1091_v22, %v1090_v14  ;;  %v1117_v27 = vrot.slane %v1116_v24, 1 }
 0x5f6   :  { %v1109_v31 = vadd.f32 %v1108_v25, %v1107_v18  ;;  %v1833_v25 = vld [vmem:[%s2724_s0 + $0x8] sm:$0xff] }
 0x5f7   :  { %1183 = vmatprep.mubr.f32.mxu1 %v1092_v26  ;;  %v1118_v29 = vadd.f32 %v1117_v27, %v1116_v24 }
 0x5f8   :  { %1184 = vmatmul.mubr.f32.vlgmr.msra.gmra.mrb[16].mxu1 %v1083_v28  ;;  %v1835_v28 = vld [vmem:[%s2724_s0 + $0x18] sm:$0xff] }
 0x5f9   :  { %1256 = vmatprep.mubr.f32.mxu0 %v1118_v29 }
 0x5fa   :  { %1257 = vmatmul.mubr.f32.vlgmr.msra.gmra.mrb[20].mxu0 %v1109_v31  ;;  %v1836_v31 = vld [vmem:[%s2724_s0 + $0x20] sm:$0xff] }
 0x6cb   :  { %v1185_v33 = vpop.f32.mrb[16].mxu1 }
 0x6cc   :  { %v1190_v34 = vmul.f32 0.001953125, %v1185_v33  ;;  %v1187_v35 = vpop.f32.mrb[17].mxu1 }
 0x6cd   :  { %v1191_v36 = vmul.f32 0.001953125, %v1187_v35  ;;  %v1258_v39 = vpop.f32.mrb[20].mxu0 }
 0x6ce   :  { %v1265_v42 = vmul.f32 %v1190_v34, %v1190_v34  ;;  %v1263_v43 = vmul.f32 0.001953125, %v1258_v39  ;;  %v1260_v44 = vpop.f32.mrb[21].mxu0 }
 0x6cf   :  { %v1266_v23 = vmul.f32 %v1191_v36, %v1191_v36  ;;  %v1264_v30 = vmul.f32 0.001953125, %v1260_v44 }
 0x6d0   :  { %v1267_v50 = vsub.f32 %v1263_v43, %v1265_v42  ;;  %v1839_v42 = vld [vmem:[%s2724_s0 + $0x38] sm:$0xff] }
 0x6d1   :  { %v1268_v51 = vsub.f32 %v1264_v30, %v1266_v23 }
 0x6d2   :  { %v1269_v52 = vmax.f32 %v1267_v50, 0.0 }
 0x6d3   :  { %v1270_v56 = vmax.f32 %v1268_v51, 0.0 }
 0x6d4   :  { %v1271_v57 = vadd.f32 1e-05, %v1269_v52 }
 0x6d5   :  { %v1272_v58 = vadd.f32 1e-05, %v1270_v56 }
 0x6d6   :  { %1828 = vrsqrt.f32 %v1271_v57 }
 0x6d7   :  { %1830 = vrsqrt.f32 %v1272_v58 }
 0x6e0   :  { %v1829_v62 = vpop.eup %1828 }
 0x6e1   :  { %v1831_v5 = vpop.eup %1830 }
 0x6e2   :  { %v1277_v10 = vcombine.low %v1829_v62, %v1831_v5 }
 0x6e4   :  { %v1284_v11 = vrot.slane %v1277_v10, %v1283_v9 }
 0x6e6   :  { %v1291_v37 = vrot.slane %v1284_v11, %v1283_v9 }
 0x6e8   :  { %v1293_v40 = vmul.f32 %v1291_v37, %v1073_v13 }
 0x6ea   :  { %v1298_v41 = vrot.slane %v1293_v40, %v2148_v21  ;;  %v1302_v32 = vrot.slane %v1293_v40, %v1301_v38 }
 0x6ec   :  { %v1305_v12 = vmul.f32 %v1298_v41, %v1190_v34  ;;  %v1306_v15 = vmul.f32 %v1302_v32, %v1191_v36  ;;  %v1326_v47 = vmul.f32 %v1298_v41, %v2617_v45  ;;  %v1327_v48 = vmul.f32 %v1302_v32, %v2619_v46  ;;  %v1074_v45 = vld [vmem:[%s2735_s12] sm:$0x3]  ;;  %v1837_v34 = vld [vmem:[%s2724_s0 + $0x28] sm:$0xff]  ;;  %v1838_v36 = vld [vmem:[%s2724_s0 + $0x30] sm:$0xff] }
 0x6ed   :  { %v1328_v53 = vmul.f32 %v1298_v41, %v2621_v49  ;;  %v1329_v54 = vmul.f32 %v1302_v32, %v2629_v55  ;;  %v1330_v59 = vmul.f32 %v1298_v41, %v2637_v1  ;;  %v1331_v60 = vmul.f32 %v1302_v32, %v2642_v2 }
 0x6ee   :  { %v1309_v4 = vcombine.low %v1305_v12, %v1306_v15  ;;  %v1332_v19 = vmul.f32 %v1298_v41, %v2647_v7  ;;  %v1333_v6 = vmul.f32 %v1302_v32, %v2652_v17  ;;  %v1832_v17 = vld [vmem:[%s2724_s0] sm:$0xff] }
 0x6f0   :  { %v1316_v63 = vrot.slane %v1309_v4, %v1283_v9 }
 0x6f2   :  { %v1323_v8 = vrot.slane %v1316_v63, %v1283_v9 }
 0x6f4   :  { %v1325_v46 = vsub.f32 %v1074_v45, %v1323_v8 }
 0x6f6   :  { %v1338_v49 = vrot.slane %v1325_v46, %v2148_v21  ;;  %v1342_v14 = vrot.slane %v1325_v46, %v1301_v38  ;;  %v1834_v21 = vld [vmem:[%s2724_s0 + $0x10] sm:$0xff] }
 0x6f8   :  { %v1345_v55 = vadd.f32 %v1338_v49, %v1326_v47  ;;  %v1346_v16 = vadd.f32 %v1342_v14, %v1327_v48  ;;  %v1347_v1 = vadd.f32 %v1338_v49, %v1328_v53  ;;  %v1348_v18 = vadd.f32 %v1342_v14, %v1329_v54 }
 0x6f9   :  { %v1349_v2 = vadd.f32 %v1338_v49, %v1330_v59  ;;  %v1350_v20 = vadd.f32 %v1342_v14, %v1331_v60  ;;  %v1351_v22 = vadd.f32 %v1338_v49, %v1332_v19  ;;  %v1352_v7 = vadd.f32 %v1342_v14, %v1333_v6 }
 0x6fa   :  { %v1353_v24 = vadd.f32 %v1832_v17, %v1345_v55  ;;  %v1354_v26 = vadd.f32 %v1833_v25, %v1346_v16  ;;  %v1355_v27 = vadd.f32 %v1834_v21, %v1347_v1  ;;  %v1356_v29 = vadd.f32 %v1835_v28, %v1348_v18 }
 0x6fb   :  { %v1357_v33 = vadd.f32 %v1836_v31, %v1349_v2  ;;  %v1358_v35 = vadd.f32 %v1837_v34, %v1350_v20  ;;  %v1359_v39 = vadd.f32 %v1838_v36, %v1351_v22  ;;  %v1360_v43 = vadd.f32 %v1839_v42, %v1352_v7 }
 0x6fc   :  { %v1361_v44 = vmax.f32 %v1353_v24, 0.0  ;;  %v1362_v23 = vmax.f32 %v1354_v26, 0.0  ;;  %v1363_v30 = vmax.f32 %v1355_v27, 0.0  ;;  %v1364_v50 = vmax.f32 %v1356_v29, 0.0 }
 0x6fd   :  { %v1365_v51 = vmax.f32 %v1357_v33, 0.0  ;;  %v1366_v52 = vmax.f32 %v1358_v35, 0.0  ;;  %v1367_v56 = vmax.f32 %v1359_v39, 0.0  ;;  %v1368_v57 = vmax.f32 %v1360_v43, 0.0 }
 0x6fe   :  { %1369 = vst [vmem:[%s2736_s13] sm:$0xff] %v1361_v44  ;;  %1370 = vst [vmem:[%s2736_s13 + $0x8] sm:$0xff] %v1362_v23 }
 0x6ff   :  { %1371 = vst [vmem:[%s2736_s13 + $0x10] sm:$0xff] %v1363_v30  ;;  %1372 = vst [vmem:[%s2736_s13 + $0x18] sm:$0xff] %v1364_v50 }
 0x700   :  { %1373 = vst [vmem:[%s2736_s13 + $0x20] sm:$0xff] %v1365_v51  ;;  %1374 = vst [vmem:[%s2736_s13 + $0x28] sm:$0xff] %v1366_v52 }
 0x701   :  { %1375 = vst [vmem:[%s2736_s13 + $0x30] sm:$0xff] %v1367_v56  ;;  %1376 = vst [vmem:[%s2736_s13 + $0x38] sm:$0xff] %v1368_v57 }

</bundles_post_ra>
